<compile_context>
chip_gen: v6e
topology: v6e:2x2x1
jax: 0.10.0
libtpu: 0.0.40
codegen_flags: <defaults>
</compile_context>

<pallas_src>
import functools

import jax
import jax.numpy as jnp
from jax.experimental import pallas as pl
from jax.experimental.pallas import tpu as pltpu


# ----------------------------------------------------------------------------
# Kernels
# ----------------------------------------------------------------------------
def _ffn_resident_kernel(x_ref, w1_ref, b1_ref, w2_ref, b2_ref, o_ref):
    # Weights fully resident in VMEM (constant index_map -> fetched once).
    # x_ref: (tm, d_model), w1_ref: (d_model, d_ff), w2_ref: (d_ff, d_model).
    h = jnp.dot(x_ref[...], w1_ref[...], preferred_element_type=jnp.float32)
    h = jnp.maximum(h + b1_ref[...], 0.0)          # bias + ReLU in f32
    out = jnp.dot(h.astype(w2_ref.dtype), w2_ref[...],
                  preferred_element_type=jnp.float32)
    o_ref[...] = (out + b2_ref[...]).astype(o_ref.dtype)


def _ffn_streaming_kernel(x_ref, w1_ref, b1_ref, w2_ref, b2_ref, o_ref, acc_ref):
    # x_ref:  (tm, d_model)  row tile (resident across k)
    # w1_ref: (d_model, tk)  slab of W1 along the hidden dim
    # b1_ref: (1, tk)
    # w2_ref: (tk, d_model)  matching slab of W2
    # acc_ref:(tm, d_model)  f32 accumulator, resident across the k axis
    k = pl.program_id(1)

    @pl.when(k == 0)
    def _init():
        acc_ref[...] = jnp.zeros_like(acc_ref)

    h = jnp.dot(x_ref[...], w1_ref[...], preferred_element_type=jnp.float32)
    h = jnp.maximum(h + b1_ref[...], 0.0)           # ReLU splits freely over d_ff
    acc_ref[...] += jnp.dot(h.astype(w2_ref.dtype), w2_ref[...],
                            preferred_element_type=jnp.float32)

    @pl.when(k == pl.num_programs(1) - 1)
    def _finalize():
        o_ref[...] = (acc_ref[...] + b2_ref[...]).astype(o_ref.dtype)


# ----------------------------------------------------------------------------
# pallas_call builders
# ----------------------------------------------------------------------------
@functools.partial(jax.jit, static_argnames=("tm", "out_dtype", "vmem_limit"))
def _ffn_resident(x2d, w1, b1_2d, w2, b2_2d, *, tm, out_dtype, vmem_limit):
    M, d_model = x2d.shape
    d_ff = w1.shape[1]
    act_isz = x2d.dtype.itemsize
    w_isz = w1.dtype.itemsize
    o_isz = jnp.dtype(out_dtype).itemsize

    cost = pl.CostEstimate(
        flops=4 * M * d_model * d_ff + 2 * M * (d_ff + d_model),
        transcendentals=0,
        bytes_accessed=M * d_model * (act_isz + o_isz)
        + (w1.size + w2.size) * w_isz
        + (b1_2d.size + b2_2d.size) * 4,   # weights touched exactly once
    )

    return pl.pallas_call(
        _ffn_resident_kernel,
        out_shape=jax.ShapeDtypeStruct((M, d_model), out_dtype),
        grid_spec=pltpu.PrefetchScalarGridSpec(
            num_scalar_prefetch=0,
            grid=(M // tm,),
            in_specs=[
                pl.BlockSpec((tm, d_model), lambda i: (i, 0)),      # x row tile
                pl.BlockSpec((d_model, d_ff), lambda i: (0, 0)),    # W1 (resident)
                pl.BlockSpec((1, d_ff), lambda i: (0, 0)),          # b1
                pl.BlockSpec((d_ff, d_model), lambda i: (0, 0)),    # W2 (resident)
                pl.BlockSpec((1, d_model), lambda i: (0, 0)),       # b2
            ],
            out_specs=pl.BlockSpec((tm, d_model), lambda i: (i, 0)),
        ),
        compiler_params=pltpu.CompilerParams(
            dimension_semantics=("parallel",),
            vmem_limit_bytes=vmem_limit,
        ),
        cost_estimate=cost,
    )(x2d, w1, b1_2d, w2, b2_2d)


@functools.partial(jax.jit, static_argnames=("tm", "tk", "out_dtype", "vmem_limit"))
def _ffn_streaming(x2d, w1, b1_2d, w2, b2_2d, *, tm, tk, out_dtype, vmem_limit):
    M, d_model = x2d.shape
    d_ff = w1.shape[1]
    act_isz = x2d.dtype.itemsize
    w_isz = w1.dtype.itemsize
    o_isz = jnp.dtype(out_dtype).itemsize
    n_row_tiles = M // tm

    cost = pl.CostEstimate(
        flops=4 * M * d_model * d_ff + 2 * M * (d_ff + d_model),
        transcendentals=0,
        # W1/W2/b1 are re-streamed once per row tile (k wraps for every i).
        bytes_accessed=M * d_model * (act_isz + o_isz)
        + n_row_tiles * ((w1.size + w2.size) * w_isz + b1_2d.size * 4)
        + b2_2d.size * 4,
    )

    return pl.pallas_call(
        _ffn_streaming_kernel,
        out_shape=jax.ShapeDtypeStruct((M, d_model), out_dtype),
        grid_spec=pltpu.PrefetchScalarGridSpec(
            num_scalar_prefetch=0,
            grid=(M // tm, d_ff // tk),
            in_specs=[
                pl.BlockSpec((tm, d_model), lambda i, k: (i, 0)),   # x row tile
                pl.BlockSpec((d_model, tk), lambda i, k: (0, k)),   # W1 slab
                pl.BlockSpec((1, tk), lambda i, k: (0, k)),         # b1 slab
                pl.BlockSpec((tk, d_model), lambda i, k: (k, 0)),   # W2 slab
                pl.BlockSpec((1, d_model), lambda i, k: (0, 0)),    # b2
            ],
            out_specs=pl.BlockSpec((tm, d_model), lambda i, k: (i, 0)),
            scratch_shapes=[pltpu.VMEM((tm, d_model), jnp.float32)],
        ),
        compiler_params=pltpu.CompilerParams(
            dimension_semantics=("parallel", "arbitrary"),
            vmem_limit_bytes=vmem_limit,
        ),
        cost_estimate=cost,
    )(x2d, w1, b1_2d, w2, b2_2d)


# ----------------------------------------------------------------------------
# Wrapper: tile selection, padding, VMEM budgeting
# ----------------------------------------------------------------------------
def _round_up(x, m):
    return ((x + m - 1) // m) * m


def _vmem_budget():
    """Generation-aware VMEM budget (~0.8x physical; conservative fallback)."""
    cap = 0
    try:
        cap = int(getattr(pltpu.get_tpu_info(), "vmem_capacity_bytes", 0))
    except Exception:
        cap = 0
    if cap <= 0:
        cap = 64 << 20          # v7x floor; safe everywhere
    return int(cap * 0.8)


def positionwise_ffn(x, w1, b1, w2, b2, *, compute_dtype=None, tm=None, tk=None,
                     force_streaming=False):
    """x: (batch, seq, d_model) -> (out, None), matching the PyTorch module.

    compute_dtype: dtype for x/W1/W2 inside the matmuls (e.g. jnp.bfloat16 for
        2-4x MXU throughput); accumulation stays f32 and the output keeps
        x.dtype.  Defaults to x.dtype (bit-faithful to the f32 reference).
    tm: row tile over batch*seq tokens (default 512, capped so the parallel
        axis keeps >= 2 grid steps for megacore).
    tk: hidden-dim slab width for the streaming path (default: as large as the
        VMEM budget allows).
    """
    B, S, d_model = x.shape
    d_ff = w1.shape[1]
    M = B * S
    out_dtype = x.dtype
    compute_dtype = jnp.dtype(compute_dtype) if compute_dtype is not None else jnp.dtype(x.dtype)

    c_isz = compute_dtype.itemsize
    o_isz = jnp.dtype(out_dtype).itemsize
    budget = _vmem_budget()

    # ---- row tile over tokens -------------------------------------------------
    tm_align = 16 if c_isz < 4 else 8          # packed-sublane friendly for bf16
    if tm is None:
        tm = 512
    tm = max(tm_align, (min(tm, _round_up(M, tm_align)) // tm_align) * tm_align)
    # keep >= 2 grid steps on the parallel axis so both v7x TensorCores get work
    if tm >= M and M > tm_align:
        tm = _round_up(-(-M // 2), tm_align)

    # ---- hidden dim (lane-align; zero-padding is exact for relu/matmul) -------
    d_ff_p = _round_up(d_ff, 128)

    # ---- path selection --------------------------------------------------------
    resident_need = (
        2 * tm * d_model * c_isz                 # x tile (double buffered)
        + 2 * tm * d_model * o_isz               # out tile
        + 2 * 2 * d_model * d_ff_p * c_isz       # W1 + W2 (budget 2x buffers)
        + 2 * (d_ff_p + d_model) * 4             # biases
        + tm * d_ff_p * 4                        # f32 hidden intermediate
    )
    use_resident = (not force_streaming) and resident_need <= budget

    if not use_resident:
        def _fixed(tm_):
            return (2 * tm_ * d_model * c_isz + 2 * tm_ * d_model * o_isz
                    + tm_ * d_model * 4 + 2 * d_model * 4)
        per_tk = 2 * 2 * d_model * c_isz + 2 * 4   # W1 col + W2 row slabs (x2 buf) + b1
        while tm > tm_align and _fixed(tm) + 128 * per_tk > budget:
            tm = max(tm_align, (tm // 2 // tm_align) * tm_align)
        tk_max = max(128, (budget - _fixed(tm)) // per_tk)
        if tk is None:
            tk = d_ff_p                           # as large as the budget allows
        tk = max(128, (min(tk, tk_max, d_ff_p) // 128) * 128)
        d_ff_p = _round_up(d_ff_p, tk)

    M_pad = _round_up(M, tm)

    # ---- pad + cast inputs -----------------------------------------------------
    x2d = x.reshape(M, d_model)
    if M_pad != M:
        x2d = jnp.pad(x2d, ((0, M_pad - M), (0, 0)))
    if d_ff_p != d_ff:
        w1 = jnp.pad(w1, ((0, 0), (0, d_ff_p - d_ff)))
        b1 = jnp.pad(b1, (0, d_ff_p - d_ff))
        w2 = jnp.pad(w2, ((0, d_ff_p - d_ff), (0, 0)))
    x2d = x2d.astype(compute_dtype)
    w1c = w1.astype(compute_dtype)
    w2c = w2.astype(compute_dtype)
    b1_2d = b1.reshape(1, d_ff_p).astype(jnp.float32)    # biases stay f32
    b2_2d = b2.reshape(1, d_model).astype(jnp.float32)

    # ---- dispatch ----------------------------------------------------------------
    if use_resident:
        vmem_limit = int(min(budget, resident_need + (8 << 20)))
        out2d = _ffn_resident(x2d, w1c, b1_2d, w2c, b2_2d,
                              tm=tm, out_dtype=out_dtype, vmem_limit=vmem_limit)
    else:
        need = (2 * tm * d_model * c_isz + 2 * tm * d_model * o_isz
                + 2 * 2 * d_model * tk * c_isz + 2 * (tk + d_model) * 4
                + tm * d_model * 4)
        vmem_limit = int(min(budget, need + (8 << 20)))
        out2d = _ffn_streaming(x2d, w1c, b1_2d, w2c, b2_2d,
                               tm=tm, tk=tk, out_dtype=out_dtype,
                               vmem_limit=vmem_limit)

    if M_pad != M:
        out2d = out2d[:M]
    return out2d.reshape(B, S, d_model), None


def init_params(key, d_model, d_ff, dtype=jnp.float32):
    """Deterministic init mirroring nn.Linear (uniform(-1/sqrt(fan_in), +))."""
    k1, k2, k3, k4 = jax.random.split(key, 4)
    bound1 = 1.0 / (d_model ** 0.5)
    bound2 = 1.0 / (d_ff ** 0.5)
    # Stored as (in, out): transpose of PyTorch's (out, in) weight layout.
    w1 = jax.random.uniform(k1, (d_model, d_ff), dtype, -bound1, bound1)
    b1 = jax.random.uniform(k2, (d_ff,), dtype, -bound1, bound1)
    w2 = jax.random.uniform(k3, (d_ff, d_model), dtype, -bound2, bound2)
    b2 = jax.random.uniform(k4, (d_model,), dtype, -bound2, bound2)
    return w1, b1, w2, b2


if __name__ == "__main__":
    key = jax.random.PRNGKey(0)
    batch, seq, d_model, d_ff = 2, 128, 256, 512   # M = 256 tokens
    dropout = 0.1                                  # eval mode -> identity

    kx, kp = jax.random.split(key)
    x = jax.random.normal(kx, (batch, seq, d_model), jnp.float32)
    w1, b1, w2, b2 = init_params(kp, d_model, d_ff)

    # Plain-JAX reference (highest-precision matmuls).
    hp = jax.lax.Precision.HIGHEST
    ref = jnp.maximum(jnp.dot(x, w1, precision=hp) + b1, 0.0)
    ref = jnp.dot(ref, w2, precision=hp) + b2

    # 1) Default path: weights resident in VMEM (fetched once), fused body.
    out, aux = positionwise_ffn(x, w1, b1, w2, b2)
    out = jax.block_until_ready(out)
    assert out.shape == (batch, seq, d_model) and aux is None
    err = float(jnp.max(jnp.abs(out - ref)))
    assert jnp.allclose(out, ref, atol=2e-3, rtol=2e-3), err

    # 2) Streaming path (d_ff split into tk slabs, f32 VMEM accumulator).
    out_s, _ = positionwise_ffn(x, w1, b1, w2, b2, tk=256, force_streaming=True)
    out_s = jax.block_until_ready(out_s)
    err_s = float(jnp.max(jnp.abs(out_s - ref)))
    assert jnp.allclose(out_s, ref, atol=2e-3, rtol=2e-3), err_s

    # 3) bf16 matmuls with f32 accumulation (recommended production config).
    out_b, _ = positionwise_ffn(x, w1, b1, w2, b2, compute_dtype=jnp.bfloat16)
    out_b = jax.block_until_ready(out_b)
    err_b = float(jnp.max(jnp.abs(out_b - ref)))
    assert jnp.allclose(out_b, ref, atol=1e-1, rtol=1e-1), err_b

    print("KERNEL_OK")
</pallas_src>

<mosaic_0001>
module attributes {stable_mosaic.version = 11 : i64} {
  func.func @_ffn_resident_kernel(%arg0: i32, %arg1: memref<128x256xf32, #tpu.memory_space<vmem>>, %arg2: memref<256x512xf32, #tpu.memory_space<vmem>>, %arg3: memref<1x512xf32, #tpu.memory_space<vmem>>, %arg4: memref<512x256xf32, #tpu.memory_space<vmem>>, %arg5: memref<1x256xf32, #tpu.memory_space<vmem>>, %arg6: memref<128x256xf32, #tpu.memory_space<vmem>>) attributes {dimension_semantics = [#tpu.dimension_semantics<parallel>], iteration_bounds = array<i64: 2>, scalar_prefetch = 0 : i64, scratch_operands = 0 : i64, tpu.core_type = #tpu.core_type<tc>, window_params = [{transform_indices = @transform_0, window_bounds = array<i64: 128, 256>}, {pipeline_mode = #tpu.pipeline_mode<synchronous>, transform_indices = @transform_1, window_bounds = array<i64: 256, 512>}, {pipeline_mode = #tpu.pipeline_mode<synchronous>, transform_indices = @transform_2, window_bounds = array<i64: 1, 512>}, {pipeline_mode = #tpu.pipeline_mode<synchronous>, transform_indices = @transform_3, window_bounds = array<i64: 512, 256>}, {pipeline_mode = #tpu.pipeline_mode<synchronous>, transform_indices = @transform_4, window_bounds = array<i64: 1, 256>}, {transform_indices = @transform_5, window_bounds = array<i64: 128, 256>}]} {
    %c0 = arith.constant 0 : index
    %c0_0 = arith.constant 0 : index
    %0 = vector.load %arg1[%c0, %c0_0] : memref<128x256xf32, #tpu.memory_space<vmem>>, vector<128x256xf32>
    %c0_1 = arith.constant 0 : index
    %c0_2 = arith.constant 0 : index
    %1 = vector.load %arg2[%c0_1, %c0_2] : memref<256x512xf32, #tpu.memory_space<vmem>>, vector<256x512xf32>
    %cst = arith.constant dense<0.000000e+00> : vector<128x512xf32>
    %2 = tpu.matmul %0, %1, %cst {dimension_numbers = #tpu.dot_dimension_numbers<[1], [0], [0], [1], [0, 0, 1, 1], [], []>} : vector<128x256xf32>, vector<256x512xf32>, vector<128x512xf32> -> vector<128x512xf32>
    %c0_3 = arith.constant 0 : index
    %c0_4 = arith.constant 0 : index
    %3 = vector.load %arg3[%c0_3, %c0_4] : memref<1x512xf32, #tpu.memory_space<vmem>>, vector<1x512xf32>
    %4 = vector.broadcast %3 : vector<1x512xf32> to vector<128x512xf32>
    %5 = arith.addf %2, %4 : vector<128x512xf32>
    %cst_5 = arith.constant 0.000000e+00 : f32
    %6 = vector.broadcast %cst_5 : f32 to vector<128x512xf32>
    %7 = arith.maximumf %5, %6 : vector<128x512xf32>
    %c0_6 = arith.constant 0 : index
    %c0_7 = arith.constant 0 : index
    %8 = vector.load %arg4[%c0_6, %c0_7] : memref<512x256xf32, #tpu.memory_space<vmem>>, vector<512x256xf32>
    %cst_8 = arith.constant dense<0.000000e+00> : vector<128x256xf32>
    %9 = tpu.matmul %7, %8, %cst_8 {dimension_numbers = #tpu.dot_dimension_numbers<[1], [0], [0], [1], [0, 0, 1, 1], [], []>} : vector<128x512xf32>, vector<512x256xf32>, vector<128x256xf32> -> vector<128x256xf32>
    %c0_9 = arith.constant 0 : index
    %c0_10 = arith.constant 0 : index
    %10 = vector.load %arg5[%c0_9, %c0_10] : memref<1x256xf32, #tpu.memory_space<vmem>>, vector<1x256xf32>
    %11 = vector.broadcast %10 : vector<1x256xf32> to vector<128x256xf32>
    %12 = arith.addf %9, %11 : vector<128x256xf32>
    %c0_11 = arith.constant 0 : index
    %c0_12 = arith.constant 0 : index
    %13 = vector.load %arg6[%c0_11, %c0_12] : memref<128x256xf32, #tpu.memory_space<vmem>>, vector<128x256xf32>
    tpu.vector_store %arg6[%c0_11, %c0_12], %12 {strides = array<i32>} : memref<128x256xf32, #tpu.memory_space<vmem>>, vector<128x256xf32>,
    return
  }
  func.func @transform_0(%arg0: i32) -> (i32, i32) {
    %c0_i32 = arith.constant 0 : i32
    %c0_i32_0 = arith.constant 0 : i32
    return %arg0, %c0_i32 : i32, i32
  }
  func.func @transform_1(%arg0: i32) -> (i32, i32) {
    %c0_i32 = arith.constant 0 : i32
    %c0_i32_0 = arith.constant 0 : i32
    %c0_i32_1 = arith.constant 0 : i32
    return %c0_i32, %c0_i32_0 : i32, i32
  }
  func.func @transform_2(%arg0: i32) -> (i32, i32) {
    %c0_i32 = arith.constant 0 : i32
    %c0_i32_0 = arith.constant 0 : i32
    %c0_i32_1 = arith.constant 0 : i32
    return %c0_i32, %c0_i32_0 : i32, i32
  }
  func.func @transform_3(%arg0: i32) -> (i32, i32) {
    %c0_i32 = arith.constant 0 : i32
    %c0_i32_0 = arith.constant 0 : i32
    %c0_i32_1 = arith.constant 0 : i32
    return %c0_i32, %c0_i32_0 : i32, i32
  }
  func.func @transform_4(%arg0: i32) -> (i32, i32) {
    %c0_i32 = arith.constant 0 : i32
    %c0_i32_0 = arith.constant 0 : i32
    %c0_i32_1 = arith.constant 0 : i32
    return %c0_i32, %c0_i32_0 : i32, i32
  }
  func.func @transform_5(%arg0: i32) -> (i32, i32) {
    %c0_i32 = arith.constant 0 : i32
    %c0_i32_0 = arith.constant 0 : i32
    return %arg0, %c0_i32 : i32, i32
  }
}

</mosaic_0001>

<bundles_post_ra>
// kernel: _ffn_resident.1
= control target key start
LH: loop header
LB: loop body
LE: loop exit
PB: predicated region body
PF: predicated region fallthrough
CT: control target
= control target key end

     0   :  { %10 = vsyncpa [#allocation3], 0  ;;  %s2201_s0 = inlined_call_operand.hbm [shape: f32[256,256], index: 0, kind: input, shape index: {}]   ;;  %s2202_s1 = inlined_call_operand.hbm [shape: f32[256,512], index: 1, kind: input, shape index: {}]   ;;  %s2203_s2 = inlined_call_operand.hbm [shape: f32[1,512], index: 2, kind: input, shape index: {}]   ;;  %s2204_s3 = inlined_call_operand.hbm [shape: f32[512,256], index: 3, kind: input, shape index: {}]   ;;  %s2205_s4 = inlined_call_operand.vmem [shape: f32[1,256], index: 4, kind: input, shape index: {}]   ;;  %s2206_s5 = inlined_call_operand.hbm [shape: f32[256,256], index: 5, kind: output, shape index: {}]  }
   0x1   :  { %12 = vsyncpa [#allocation3 + $0x1], 0 }
   0x2   :  { %13 = vsyncpa [#allocation6], 0 }
   0x3   :  { %14 = vsyncpa [#allocation9], 0 }
   0x4   :  { %15 = vsyncpa [#allocation4], 0 }
   0x5   :  { %17 = vsyncpa [#allocation4 + $0x1], 0  ;;  %s1797_s18 = smov 0   ;;  %s1799_s19 = smov 0  }
   0x6   :  { %s1801_s20 = smov 0   ;;  %s1803_s21 = smov 0  }
   0x7 LB: > { %s1818_s22 = sadd.s32 4294967295, %s1754_s21   ;;  %s1467_s23 = sadd.s32 4294967294, %s1754_s21   ;;  %s1754_s21 = sphi %s1803_s21, %s2232_s21   ;;  %s1750_s20 = sphi %s1801_s20, %s2231_s20   ;;  %s1746_s19 = sphi %s1799_s19, %s2230_s19   ;;  %s1742_s18 = sphi %s1797_s18, %s2229_s18  }
   0x8   : > { %p43_p0 = scmp.ne.s32.totalorder %s1746_s19, %s1742_s18  ;;  %p2207_p1 = scmp.eq.s32.totalorder %s1818_s22, 0 }
   0x9   : > { %p157_p3 = scmp.eq.s32.totalorder %s1467_s23, 1  ;;  %p1468_p5 = scmp.ge.s32.totalorder %s1754_s21, 1 }
   0xa   : > { %p1827_p4 = por %p2207_p1, %p43_p0  ;;  %p164_p7 = scmp.lt.s32.totalorder %s1754_s21, 3 }
   0xb   : > { %p1832_p6 = por %p157_p3, %p43_p0  ;;  %s1756_s27 = smov [#allocation5]  }
   0xc   : > { %s2212_s24 = scalar_select %p1827_p4, 1, 0 }
   0xd   : > { %s2213_s25 = scalar_select %p1832_p6, 1, 0 }
   0xe   : > { %p1837_p8 = pnand %p1468_p5, %p164_p7  ;;  %s176_s28 = sshll.u32 %s1756_s27, 4  ;;  %s177_s28 = int_to_ptr.vmem [resolvable:$true] %s176_s28 }
   0xf   : > { %s1757_s30 = smov [#allocation7]   ;;  %s1758_s7 = smov [#allocation8]  }
  0x10   : > { %s2214_s26 = scalar_select %p1837_p8, 1, 0 }
  0x11   : > { %p1509_p9 = pneg %p1837_p8  ;;  %s190_s6 = sshll.u32 %s1757_s30, 4  ;;  %s191_s6 = int_to_ptr.vmem [resolvable:$true] %s190_s6 }
  0x12   : > { %s200_s8 = sshll.u32 %s1758_s7, 4  ;;  %s1587_s9 = scalar_lea.vmem %s177_s28, 16384  ;;  %s201_s8 = int_to_ptr.vmem [resolvable:$true] %s200_s8 }
  0x13   : > { %p1846_p11 = pnand %p1509_p9, %p2207_p1  ;;  %p1588_p13 = scmp.ne.s32.totalorder %s177_s28, %s1587_s9 }
  0x14   : > { %p1595_p5 = scmp.lt.s32.totalorder %s177_s28, %s177_s28  ;;  %p1596_p7 = scmp.lt.s32.totalorder %s1587_s9, %s1587_s9 }
  0x15   : > { %p1578_p12 = pneg %p1846_p11 }
  0x16   : > { %p1597_p9 = por %p1596_p7, %p1595_p5 }
  0x17   : > { %p1590_p0 = pnand %p1588_p13, %p1578_p12 }
  0x19   : > { %p1591_p3 = pneg %p1590_p0 }
  0x1b   : > { %p1598_p10 = pnand %p1597_p9, %p1591_p3 }
  0x1d   : > { %1601 = shalt.err (!%p1598_p10)
}
  0x1e   : > { %s1759_s10 = smov 512   ;;  %s1760_s11 = smov 32  }
  0x1f   : > { %1512 = dma.hbm_to_vmem [thread:$0]  (!%p1846_p11), %s2202_s1, 16384, %s177_s28, [#allocation6], %s1759_s10, %s1759_s10, %s1760_s11  }
  0x20   : > { %s1613_s14 = scalar_lea.vmem %s191_s6, 64  ;;  %p1621_p2 = scmp.lt.s32.totalorder %s191_s6, %s191_s6 }
  0x21   : > { %p1614_p1 = scmp.ne.s32.totalorder %s191_s6, %s1613_s14  ;;  %p1622_p6 = scmp.lt.s32.totalorder %s1613_s14, %s1613_s14 }
  0x23   : > { %p1616_p13 = pnand %p1614_p1, %p1578_p12  ;;  %p1623_p5 = por %p1622_p6, %p1621_p2 }
  0x25   : > { %p1617_p0 = pneg %p1616_p13 }
  0x27   : > { %p1624_p3 = pnand %p1623_p5, %p1617_p0 }
  0x29   : > { %1627 = shalt.err (!%p1624_p3)
}
  0x2a   : > { %1515 = dma.hbm_to_vmem [thread:$0]  (!%p1846_p11), %s2203_s2, 64, %s191_s6, [#allocation6]  }
  0x2b   : > { %s1639_s17 = scalar_lea.vmem %s201_s8, 16384  ;;  %p1647_p9 = scmp.lt.s32.totalorder %s201_s8, %s201_s8 }
  0x2c   : > { %p1640_p10 = scmp.ne.s32.totalorder %s201_s8, %s1639_s17  ;;  %p1648_p13 = scmp.lt.s32.totalorder %s1639_s17, %s1639_s17 }
  0x2e   : > { %p1642_p7 = pnand %p1640_p10, %p1578_p12  ;;  %p1649_p4 = por %p1648_p13, %p1647_p9 }
  0x30   : > { %p1643_p1 = pneg %p1642_p7 }
  0x32   : > { %p1650_p2 = pnand %p1649_p4, %p1643_p1 }
  0x34   : > { %1653 = shalt.err (!%p1650_p2)
}
  0x35   : > { %s2209_s23 = smov 256   ;;  %s1762_s27 = smov 16  }
  0x36   : > { %1518 = dma.hbm_to_vmem [thread:$0]  (!%p1846_p11), %s2204_s3, 16384, %s201_s8, [#allocation9], %s2209_s23, %s2209_s23, %s1762_s27  }
  0x37   : > { %s1880_s6 = sadd.s32 1, %s1754_s21   ;;  %s30_s9 = sadd.s32 1, %s1750_s20 }
  0x38   : > { %s27_s7 = ssub.s32 %s1754_s21, %s1880_s6  ;;  %p37_p6 = scmp.ne.s32.totalorder %s1750_s20, %s1746_s19 }
  0x39   : > { %p28_p4 = scmp.eq.s32.totalorder %s27_s7, 0  ;;  %p38_p12 = scmp.eq.s32.totalorder %s1754_s21, 0 }
  0x3a   : > { %p1530_p0 = scmp.lt.s32.totalorder %s1754_s21, 2  ;;  %p2216_p3 = scmp.eq.s32.totalorder %s1818_s22, 1 }
  0x3b   : > { %s1890_s10 = scalar_select %p28_p4, %s1750_s20, %s30_s9  }
  0x3c   : > { %p39_p5 = por %p38_p12, %p37_p6  ;;  %p1894_p10 = por %p2216_p3, %p37_p6 }
  0x3d   : > { %s217_s11 = sand.u32 1, %s1750_s20   ;;  %s1490_s12 = sshll.u32 %s1754_s21, 12 }
  0x3e   : > { %s2217_s29 = scalar_select %p1894_p10, 1, 0 }
  0x3f   : > { %s1473_s8 = sshll.u32 %s217_s11, 8  ;;  %s1903_s15 = scalar_lea.hbm %s2201_s0, %s1490_s12 }
  0x40   : > { %s221_s16 = scalar_lea.vmem [#allocation2], %s1473_s8  ;;  %p1905_p11 = pnand %p1530_p0, %p39_p5 }
  0x41   : > { %s229_s17 = sshll.u32 %s221_s16, 4  ;;  %s1911_s30 = scalar_lea.sflag [#allocation3], %s217_s11  ;;  %s1909_s17 = int_to_ptr.vmem [resolvable:$true] %s229_s17 }
  0x42   : > { %s1654_s7 = scalar_lea.hbm %s1903_s15, 4096  ;;  %p1656_p1 = pneg %p1905_p11 }
  0x43   : > { %p1655_p7 = scmp.ne.s32.totalorder %s1903_s15, %s1654_s7  ;;  %s1659_s8 = scalar_lea.hbm %s2201_s0, 8192 }
  0x44   : > { %p1660_p2 = scmp.lt.s32.totalorder %s1903_s15, %s2201_s0  ;;  %p1661_p4 = scmp.lt.s32.totalorder %s1659_s8, %s1654_s7 }
  0x45   : > { %p1657_p9 = pnand %p1656_p1, %p1655_p7 }
  0x46   : > { %p1662_p6 = por %p1661_p4, %p1660_p2 }
  0x47   : > { %p1658_p13 = pneg %p1657_p9 }
  0x49   : > { %p1663_p12 = pnand %p1662_p6, %p1658_p13 }
  0x4b   : > { %1666 = shalt.err (!%p1663_p12)
}
  0x4c   : > { %s1667_s11 = scalar_lea.vmem %s1909_s17, 4096  ;;  %s1763_s16 = smov [#allocation2]  }
  0x4d   : > { %p1668_p0 = scmp.ne.s32.totalorder %s1909_s17, %s1667_s11  ;;  %s1672_s23 = sshll.u32 %s1763_s16, 4  ;;  %s1673_s23 = int_to_ptr.vmem [resolvable:$false] %s1672_s23 }
  0x4e   : > { %s1674_s9 = scalar_lea.vmem %s1673_s23, 8192  ;;  %p1675_p7 = scmp.lt.s32.totalorder %s1909_s17, %s1673_s23 }
  0x4f   : > { %p1670_p5 = pnand %p1668_p0, %p1656_p1  ;;  %p1676_p9 = scmp.lt.s32.totalorder %s1674_s9, %s1667_s11 }
  0x51   : > { %p1671_p3 = pneg %p1670_p5  ;;  %p1677_p10 = por %p1676_p9, %p1675_p7 }
  0x53   : > { %p1678_p8 = pnand %p1677_p10, %p1671_p3 }
  0x55   : > { %1681 = shalt.err (!%p1678_p8)
}
  0x56   : > { %s2219_s7 = smov 256   ;;  %p2220_p1 = scmp.ne.s32.totalorder %s2214_s26, 0 }
  0x57   : > { %1522 = dma.hbm_to_vmem [thread:$0]  (!%p1905_p11), %s1903_s15, 4096, %s1909_s17, %s1911_s30, %s2219_s7, %s2219_s7, %s1762_s27  }
  0x58   : > { %241 = sbr.rel (%p2220_p1) target bundleno = 639 (0x27f), region = 40  ;;  %s1938_s12 = sand.u32 (!%p2220_p1), 1, %s1746_s19  }
  0x59   : > { %s1478_s23 = sshll.u32 (!%p2220_p1), %s1938_s12, 8  ;;  %s244_s8 = scalar_lea.sflag (!%p2220_p1), [#allocation3], %s1938_s12 }
  0x5a   : > { %s1944_s28 = scalar_lea.vmem (!%p2220_p1), [#allocation2], %s1478_s23  ;;  %p2221_p8 = scmp.ne.s32.totalorder (!%p2220_p1), %s2212_s24, 0 }
  0x5d   : > { %1725 = dma.done.wait (%p2221_p8), %s244_s8, 4096  }
  0x5e   : > { %1727 = vsyncadd (%p2221_p8), %s244_s8, 4294963200  ;;  %p2222_p10 = scmp.eq.s32.totalorder %s1818_s22, 0 }
  0x60   : > { %1729 = dma.done.wait (%p2222_p10), [#allocation6], 16448   ;;  %p2223_p11 = pmov %p2222_p10 }
  0x61   : > { %p2224_p13 = pmov %p2222_p10 }
  0x62   : > { %1731 = vsyncadd (%p2223_p11), [#allocation6], 4294950848 }
  0x63   : > { %1733 = dma.done.wait (%p2224_p13), [#allocation9], 16384   ;;  %p2225_p2 = pmov %p2222_p10 }
  0x64   : > { %v381_v0 = vld [vmem:[#allocation5 + $0x1e8] sm:$0xff]  ;;  %v383_v1 = vld [vmem:[#allocation5 + $0x1f8] sm:$0xff]  ;;  %v380_v2 = vld [vmem:[#allocation5 + $0x1e0] sm:$0xff]  ;;  %s2087_s27 = scalar_lea.vmem [#allocation10], %s1478_s23  ;;  %s1492_s15 = sshll.u32 %s1818_s22, 12 }
  0x65   : > { %1735 = vsyncadd (%p2225_p2), [#allocation9], 4294950912  ;;  %470 = vmatprep.subr.mxu0 %v381_v0  ;;  %631 = vmatprep.subr.mxu1 %v383_v1  ;;  %v382_v3 = vld [vmem:[#allocation5 + $0x1f0] sm:$0xff]  ;;  %v377_v4 = vld [vmem:[#allocation5 + $0x1c8] sm:$0xff]  ;;  %s1365_s17 = sshll.u32 %s2087_s27, 4  ;;  %s2154_s14 = scalar_lea.hbm %s2206_s5, %s1492_s15  ;;  %s2156_s17 = int_to_ptr.vmem [resolvable:$true] %s1365_s17 }
  0x66   : > { %v379_v5 = vld [vmem:[#allocation5 + $0x1d8] sm:$0xff]  ;;  %471 = vmatpush1.msra.mxu0 %v380_v2  ;;  %632 = vmatpush1.msra.mxu1 %v382_v3  ;;  %v376_v6 = vld [vmem:[#allocation5 + $0x1c0] sm:$0xff]  ;;  %v378_v7 = vld [vmem:[#allocation5 + $0x1d0] sm:$0xff]  ;;  %s1351_s22 = scalar_lea.sflag [#allocation4], %s1938_s12  ;;  %s1682_s11 = scalar_lea.vmem %s2156_s17, 4096 }
  0x67   : > { %v373_v8 = vld [vmem:[#allocation5 + $0x1a8] sm:$0xff]  ;;  %472 = vmatprep.subr.mxu0 %v377_v4  ;;  %633 = vmatprep.subr.mxu1 %v379_v5  ;;  %v375_v9 = vld [vmem:[#allocation5 + $0x1b8] sm:$0xff]  ;;  %v372_v10 = vld [vmem:[#allocation5 + $0x1a0] sm:$0xff]  ;;  %p1683_p4 = scmp.ne.s32.totalorder %s2156_s17, %s1682_s11  ;;  %p2226_p6 = scmp.ne.s32.totalorder %s2217_s29, 0 }
  0x68   : > { %v374_v11 = vld [vmem:[#allocation5 + $0x1b0] sm:$0xff]  ;;  %473 = vmatpush1.msra.mxu0 %v376_v6  ;;  %634 = vmatpush1.msra.mxu1 %v378_v7  ;;  %v369_v12 = vld [vmem:[#allocation5 + $0x188] sm:$0xff]  ;;  %v371_v13 = vld [vmem:[#allocation5 + $0x198] sm:$0xff]  ;;  %s1764_s16 = smov [#allocation10]  }
  0x69   : > { %474 = vmatprep.subr.mxu0 %v373_v8  ;;  %635 = vmatprep.subr.mxu1 %v375_v9  ;;  %v368_v14 = vld [vmem:[#allocation5 + $0x180] sm:$0xff]  ;;  %v370_v15 = vld [vmem:[#allocation5 + $0x190] sm:$0xff]  ;;  %v365_v16 = vld [vmem:[#allocation5 + $0x168] sm:$0xff]  ;;  %p1684_p12 = pnand %p1683_p4, %p2226_p6  ;;  %s1686_s9 = sshll.u32 %s1764_s16, 4  ;;  %s1687_s9 = int_to_ptr.vmem [resolvable:$false] %s1686_s9 }
  0x6a   : > { %475 = vmatpush1.msra.mxu0 %v372_v10  ;;  %636 = vmatpush1.msra.mxu1 %v374_v11  ;;  %v367_v17 = vld [vmem:[#allocation5 + $0x178] sm:$0xff]  ;;  %v364_v18 = vld [vmem:[#allocation5 + $0x160] sm:$0xff]  ;;  %v366_v19 = vld [vmem:[#allocation5 + $0x170] sm:$0xff]  ;;  %s1688_s7 = scalar_lea.vmem %s1687_s9, 8192  ;;  %p1689_p5 = scmp.lt.s32.totalorder %s2156_s17, %s1687_s9 }
  0x6b   : > { %476 = vmatprep.subr.mxu0 %v369_v12  ;;  %637 = vmatprep.subr.mxu1 %v371_v13  ;;  %v361_v20 = vld [vmem:[#allocation5 + $0x148] sm:$0xff]  ;;  %v363_v21 = vld [vmem:[#allocation5 + $0x158] sm:$0xff]  ;;  %v360_v22 = vld [vmem:[#allocation5 + $0x140] sm:$0xff]  ;;  %p1685_p0 = pneg %p1684_p12  ;;  %p1690_p3 = scmp.lt.s32.totalorder %s1688_s7, %s1682_s11 }
  0x6c   : > { %477 = vmatpush1.msra.mxu0 %v368_v14  ;;  %638 = vmatpush1.msra.mxu1 %v370_v15  ;;  %v362_v23 = vld [vmem:[#allocation5 + $0x150] sm:$0xff]  ;;  %v357_v24 = vld [vmem:[#allocation5 + $0x128] sm:$0xff]  ;;  %v359_v25 = vld [vmem:[#allocation5 + $0x138] sm:$0xff] }
  0x6d   : > { %478 = vmatprep.subr.mxu0 %v365_v16  ;;  %639 = vmatprep.subr.mxu1 %v367_v17  ;;  %v356_v26 = vld [vmem:[#allocation5 + $0x120] sm:$0xff]  ;;  %v358_v27 = vld [vmem:[#allocation5 + $0x130] sm:$0xff]  ;;  %v353_v28 = vld [vmem:[#allocation5 + $0x108] sm:$0xff]  ;;  %p1691_p7 = por %p1690_p3, %p1689_p5 }
  0x6e   : > { %479 = vmatpush1.msra.mxu0 %v364_v18  ;;  %640 = vmatpush1.msra.mxu1 %v366_v19  ;;  %v355_v29 = vld [vmem:[#allocation5 + $0x118] sm:$0xff]  ;;  %v352_v30 = vld [vmem:[#allocation5 + $0x100] sm:$0xff]  ;;  %v354_v31 = vld [vmem:[#allocation5 + $0x110] sm:$0xff] }
  0x6f   : > { %480 = vmatprep.subr.mxu0 %v361_v20  ;;  %641 = vmatprep.subr.mxu1 %v363_v21  ;;  %v349_v32 = vld [vmem:[#allocation5 + $0xe8] sm:$0xff]  ;;  %v351_v33 = vld [vmem:[#allocation5 + $0xf8] sm:$0xff]  ;;  %v348_v34 = vld [vmem:[#allocation5 + $0xe0] sm:$0xff]  ;;  %p1692_p9 = pnand %p1691_p7, %p1685_p0 }
  0x70   : > { %481 = vmatpush1.msra.mxu0 %v360_v22  ;;  %642 = vmatpush1.msra.mxu1 %v362_v23  ;;  %v350_v35 = vld [vmem:[#allocation5 + $0xf0] sm:$0xff]  ;;  %v345_v36 = vld [vmem:[#allocation5 + $0xc8] sm:$0xff]  ;;  %v347_v37 = vld [vmem:[#allocation5 + $0xd8] sm:$0xff] }
  0x71   : > { %482 = vmatprep.subr.mxu0 %v357_v24  ;;  %643 = vmatprep.subr.mxu1 %v359_v25  ;;  %v344_v38 = vld [vmem:[#allocation5 + $0xc0] sm:$0xff]  ;;  %v346_v39 = vld [vmem:[#allocation5 + $0xd0] sm:$0xff]  ;;  %v341_v40 = vld [vmem:[#allocation5 + $0xa8] sm:$0xff] }
  0x72   : > { %483 = vmatpush1.msra.mxu0 %v356_v26  ;;  %644 = vmatpush1.msra.mxu1 %v358_v27  ;;  %v343_v41 = vld [vmem:[#allocation5 + $0xb8] sm:$0xff]  ;;  %v340_v42 = vld [vmem:[#allocation5 + $0xa0] sm:$0xff]  ;;  %v342_v43 = vld [vmem:[#allocation5 + $0xb0] sm:$0xff] }
  0x73   : > { %484 = vmatprep.subr.mxu0 %v353_v28  ;;  %645 = vmatprep.subr.mxu1 %v355_v29  ;;  %v337_v44 = vld [vmem:[#allocation5 + $0x88] sm:$0xff]  ;;  %v339_v45 = vld [vmem:[#allocation5 + $0x98] sm:$0xff]  ;;  %v336_v46 = vld [vmem:[#allocation5 + $0x80] sm:$0xff] }
  0x74   : > { %485 = vmatpush1.msra.mxu0 %v352_v30  ;;  %646 = vmatpush1.msra.mxu1 %v354_v31  ;;  %v338_v47 = vld [vmem:[#allocation5 + $0x90] sm:$0xff]  ;;  %v333_v48 = vld [vmem:[#allocation5 + $0x68] sm:$0xff]  ;;  %v335_v49 = vld [vmem:[#allocation5 + $0x78] sm:$0xff] }
  0x75   : > { %486 = vmatprep.subr.mxu0 %v349_v32  ;;  %647 = vmatprep.subr.mxu1 %v351_v33  ;;  %v332_v50 = vld [vmem:[#allocation5 + $0x60] sm:$0xff]  ;;  %v334_v51 = vld [vmem:[#allocation5 + $0x70] sm:$0xff]  ;;  %v329_v52 = vld [vmem:[#allocation5 + $0x48] sm:$0xff] }
  0x76   : > { %487 = vmatpush1.msra.mxu0 %v348_v34  ;;  %648 = vmatpush1.msra.mxu1 %v350_v35  ;;  %v331_v53 = vld [vmem:[#allocation5 + $0x58] sm:$0xff]  ;;  %v328_v54 = vld [vmem:[#allocation5 + $0x40] sm:$0xff]  ;;  %v330_v55 = vld [vmem:[#allocation5 + $0x50] sm:$0xff] }
  0x77   : > { %488 = vmatprep.subr.mxu0 %v345_v36  ;;  %649 = vmatprep.subr.mxu1 %v347_v37  ;;  %v325_v56 = vld [vmem:[#allocation5 + $0x28] sm:$0xff]  ;;  %v327_v57 = vld [vmem:[#allocation5 + $0x38] sm:$0xff]  ;;  %v324_v58 = vld [vmem:[#allocation5 + $0x20] sm:$0xff] }
  0x78   : > { %489 = vmatpush1.msra.mxu0 %v344_v38  ;;  %650 = vmatpush1.msra.mxu1 %v346_v39  ;;  %v326_v59 = vld [vmem:[#allocation5 + $0x30] sm:$0xff]  ;;  %v321_v60 = vld [vmem:[#allocation5 + $0x8] sm:$0xff]  ;;  %v323_v61 = vld [vmem:[#allocation5 + $0x18] sm:$0xff] }
  0x79   : > { %490 = vmatprep.subr.mxu0 %v341_v40  ;;  %651 = vmatprep.subr.mxu1 %v343_v41  ;;  %v320_v62 = vld [vmem:[#allocation5] sm:$0xff]  ;;  %v322_v63 = vld [vmem:[#allocation5 + $0x10] sm:$0xff]  ;;  %v445_v0 = vld [vmem:[#allocation5 + $0x3e8] sm:$0xff] }
  0x7a   : > { %491 = vmatpush1.msra.mxu0 %v340_v42  ;;  %652 = vmatpush1.msra.mxu1 %v342_v43  ;;  %v447_v1 = vld [vmem:[#allocation5 + $0x3f8] sm:$0xff]  ;;  %v444_v2 = vld [vmem:[#allocation5 + $0x3e0] sm:$0xff]  ;;  %v446_v3 = vld [vmem:[#allocation5 + $0x3f0] sm:$0xff] }
  0x7b   : > { %492 = vmatprep.subr.mxu0 %v337_v44  ;;  %653 = vmatprep.subr.mxu1 %v339_v45  ;;  %v441_v4 = vld [vmem:[#allocation5 + $0x3c8] sm:$0xff]  ;;  %v443_v5 = vld [vmem:[#allocation5 + $0x3d8] sm:$0xff]  ;;  %v440_v6 = vld [vmem:[#allocation5 + $0x3c0] sm:$0xff] }
  0x7c   : > { %493 = vmatpush1.msra.mxu0 %v336_v46  ;;  %654 = vmatpush1.msra.mxu1 %v338_v47  ;;  %v442_v7 = vld [vmem:[#allocation5 + $0x3d0] sm:$0xff]  ;;  %v437_v8 = vld [vmem:[#allocation5 + $0x3a8] sm:$0xff]  ;;  %v439_v9 = vld [vmem:[#allocation5 + $0x3b8] sm:$0xff] }
  0x7d   : > { %494 = vmatprep.subr.mxu0 %v333_v48  ;;  %655 = vmatprep.subr.mxu1 %v335_v49  ;;  %v436_v10 = vld [vmem:[#allocation5 + $0x3a0] sm:$0xff]  ;;  %v438_v11 = vld [vmem:[#allocation5 + $0x3b0] sm:$0xff]  ;;  %v433_v12 = vld [vmem:[#allocation5 + $0x388] sm:$0xff] }
  0x7e   : > { %495 = vmatpush1.msra.mxu0 %v332_v50  ;;  %656 = vmatpush1.msra.mxu1 %v334_v51  ;;  %v435_v13 = vld [vmem:[#allocation5 + $0x398] sm:$0xff]  ;;  %v432_v14 = vld [vmem:[#allocation5 + $0x380] sm:$0xff]  ;;  %v434_v15 = vld [vmem:[#allocation5 + $0x390] sm:$0xff] }
  0x7f   : > { %496 = vmatprep.subr.mxu0 %v329_v52  ;;  %657 = vmatprep.subr.mxu1 %v331_v53  ;;  %v429_v16 = vld [vmem:[#allocation5 + $0x368] sm:$0xff]  ;;  %v431_v17 = vld [vmem:[#allocation5 + $0x378] sm:$0xff]  ;;  %v428_v18 = vld [vmem:[#allocation5 + $0x360] sm:$0xff] }
  0x80   : > { %497 = vmatpush1.msra.mxu0 %v328_v54  ;;  %658 = vmatpush1.msra.mxu1 %v330_v55  ;;  %v430_v19 = vld [vmem:[#allocation5 + $0x370] sm:$0xff]  ;;  %v425_v20 = vld [vmem:[#allocation5 + $0x348] sm:$0xff]  ;;  %v427_v21 = vld [vmem:[#allocation5 + $0x358] sm:$0xff] }
  0x81   : > { %498 = vmatprep.subr.mxu0 %v325_v56  ;;  %659 = vmatprep.subr.mxu1 %v327_v57  ;;  %v424_v22 = vld [vmem:[#allocation5 + $0x340] sm:$0xff]  ;;  %v426_v23 = vld [vmem:[#allocation5 + $0x350] sm:$0xff]  ;;  %v421_v24 = vld [vmem:[#allocation5 + $0x328] sm:$0xff] }
  0x82   : > { %499 = vmatpush1.msra.mxu0 %v324_v58  ;;  %660 = vmatpush1.msra.mxu1 %v326_v59  ;;  %v423_v25 = vld [vmem:[#allocation5 + $0x338] sm:$0xff]  ;;  %v420_v26 = vld [vmem:[#allocation5 + $0x320] sm:$0xff]  ;;  %v422_v27 = vld [vmem:[#allocation5 + $0x330] sm:$0xff] }
  0x83   : > { %500 = vmatprep.subr.mxu0 %v321_v60  ;;  %661 = vmatprep.subr.mxu1 %v323_v61  ;;  %v417_v28 = vld [vmem:[#allocation5 + $0x308] sm:$0xff]  ;;  %v419_v29 = vld [vmem:[#allocation5 + $0x318] sm:$0xff]  ;;  %v416_v30 = vld [vmem:[#allocation5 + $0x300] sm:$0xff] }
  0x84   : > { %501 = vmatpush1.msra.mxu0 %v320_v62  ;;  %662 = vmatpush1.msra.mxu1 %v322_v63  ;;  %v418_v31 = vld [vmem:[#allocation5 + $0x310] sm:$0xff]  ;;  %v413_v32 = vld [vmem:[#allocation5 + $0x2e8] sm:$0xff]  ;;  %v415_v33 = vld [vmem:[#allocation5 + $0x2f8] sm:$0xff] }
  0x85   : > { %502 = vmatprep.subr.mxu0 %v445_v0  ;;  %663 = vmatprep.subr.mxu1 %v447_v1  ;;  %v412_v34 = vld [vmem:[#allocation5 + $0x2e0] sm:$0xff]  ;;  %v414_v35 = vld [vmem:[#allocation5 + $0x2f0] sm:$0xff]  ;;  %v409_v36 = vld [vmem:[#allocation5 + $0x2c8] sm:$0xff] }
  0x86   : > { %503 = vmatpush2.msra.mxu0 %v444_v2  ;;  %664 = vmatpush2.msra.mxu1 %v446_v3  ;;  %v411_v37 = vld [vmem:[#allocation5 + $0x2d8] sm:$0xff]  ;;  %v408_v38 = vld [vmem:[#allocation5 + $0x2c0] sm:$0xff]  ;;  %v410_v39 = vld [vmem:[#allocation5 + $0x2d0] sm:$0xff] }
  0x87   : > { %504 = vmatprep.subr.mxu0 %v441_v4  ;;  %665 = vmatprep.subr.mxu1 %v443_v5  ;;  %v405_v40 = vld [vmem:[#allocation5 + $0x2a8] sm:$0xff]  ;;  %v407_v41 = vld [vmem:[#allocation5 + $0x2b8] sm:$0xff]  ;;  %v404_v42 = vld [vmem:[#allocation5 + $0x2a0] sm:$0xff] }
  0x88   : > { %505 = vmatpush2.msra.mxu0 %v440_v6  ;;  %666 = vmatpush2.msra.mxu1 %v442_v7  ;;  %v406_v43 = vld [vmem:[#allocation5 + $0x2b0] sm:$0xff]  ;;  %v401_v44 = vld [vmem:[#allocation5 + $0x288] sm:$0xff]  ;;  %v403_v45 = vld [vmem:[#allocation5 + $0x298] sm:$0xff] }
  0x89   : > { %506 = vmatprep.subr.mxu0 %v437_v8  ;;  %667 = vmatprep.subr.mxu1 %v439_v9  ;;  %v400_v46 = vld [vmem:[#allocation5 + $0x280] sm:$0xff]  ;;  %v402_v47 = vld [vmem:[#allocation5 + $0x290] sm:$0xff]  ;;  %v397_v48 = vld [vmem:[#allocation5 + $0x268] sm:$0xff] }
  0x8a   : > { %507 = vmatpush2.msra.mxu0 %v436_v10  ;;  %668 = vmatpush2.msra.mxu1 %v438_v11  ;;  %v399_v49 = vld [vmem:[#allocation5 + $0x278] sm:$0xff]  ;;  %v396_v50 = vld [vmem:[#allocation5 + $0x260] sm:$0xff]  ;;  %v398_v51 = vld [vmem:[#allocation5 + $0x270] sm:$0xff] }
  0x8b   : > { %508 = vmatprep.subr.mxu0 %v433_v12  ;;  %669 = vmatprep.subr.mxu1 %v435_v13  ;;  %v393_v52 = vld [vmem:[#allocation5 + $0x248] sm:$0xff]  ;;  %v395_v53 = vld [vmem:[#allocation5 + $0x258] sm:$0xff]  ;;  %v392_v54 = vld [vmem:[#allocation5 + $0x240] sm:$0xff] }
  0x8c   : > { %509 = vmatpush2.msra.mxu0 %v432_v14  ;;  %670 = vmatpush2.msra.mxu1 %v434_v15  ;;  %v394_v55 = vld [vmem:[#allocation5 + $0x250] sm:$0xff]  ;;  %v389_v56 = vld [vmem:[#allocation5 + $0x228] sm:$0xff]  ;;  %v391_v57 = vld [vmem:[#allocation5 + $0x238] sm:$0xff] }
  0x8d   : > { %510 = vmatprep.subr.mxu0 %v429_v16  ;;  %671 = vmatprep.subr.mxu1 %v431_v17  ;;  %v388_v58 = vld [vmem:[#allocation5 + $0x220] sm:$0xff]  ;;  %v390_v59 = vld [vmem:[#allocation5 + $0x230] sm:$0xff]  ;;  %v385_v60 = vld [vmem:[#allocation5 + $0x208] sm:$0xff] }
  0x8e   : > { %511 = vmatpush2.msra.mxu0 %v428_v18  ;;  %672 = vmatpush2.msra.mxu1 %v430_v19  ;;  %v387_v61 = vld [vmem:[#allocation5 + $0x218] sm:$0xff]  ;;  %v384_v62 = vld [vmem:[#allocation5 + $0x200] sm:$0xff]  ;;  %v289_v63 = vld [vmem:[%s1944_s28 + $0x8] sm:$0xff] }
  0x8f   : > { %512 = vmatprep.subr.mxu0 %v425_v20  ;;  %673 = vmatprep.subr.mxu1 %v427_v21  ;;  %v386_v0 = vld [vmem:[#allocation5 + $0x210] sm:$0xff]  ;;  %v288_v1 = vld [vmem:[%s1944_s28] sm:$0xff]  ;;  %v291_v2 = vld [vmem:[%s1944_s28 + $0x18] sm:$0xff] }
  0x90   : > { %513 = vmatpush2.msra.mxu0 %v424_v22  ;;  %674 = vmatpush2.msra.mxu1 %v426_v23  ;;  %v887_v3 = vld [vmem:[#allocation8 + $0xf8] sm:$0xff]  ;;  %v886_v5 = vld [vmem:[#allocation8 + $0xf0] sm:$0xff]  ;;  %v293_v8 = vld [vmem:[%s1944_s28 + $0x28] sm:$0xff] }
  0x91   : > { %514 = vmatprep.subr.mxu0 %v421_v24  ;;  %675 = vmatprep.subr.mxu1 %v423_v25  ;;  %v951_v4 = vld [vmem:[#allocation8 + $0x2f8] sm:$0xff]  ;;  %v950_v6 = vld [vmem:[#allocation8 + $0x2f0] sm:$0xff]  ;;  %v885_v9 = vld [vmem:[#allocation8 + $0xe8] sm:$0xff] }
  0x92   : > { %515 = vmatpush2.msra.mxu0 %v420_v26  ;;  %676 = vmatpush2.msra.mxu1 %v422_v27  ;;  %v290_v7 = vld [vmem:[%s1944_s28 + $0x10] sm:$0xff]  ;;  %v884_v11 = vld [vmem:[#allocation8 + $0xe0] sm:$0xff]  ;;  %v295_v14 = vld [vmem:[%s1944_s28 + $0x38] sm:$0xff] }
  0x93   : > { %516 = vmatprep.subr.mxu0 %v417_v28  ;;  %677 = vmatprep.subr.mxu1 %v419_v29  ;;  %v949_v10 = vld [vmem:[#allocation8 + $0x2e8] sm:$0xff]  ;;  %v948_v12 = vld [vmem:[#allocation8 + $0x2e0] sm:$0xff]  ;;  %v883_v15 = vld [vmem:[#allocation8 + $0xd8] sm:$0xff] }
  0x94   : > { %517 = vmatpush2.msra.mxu0 %v416_v30  ;;  %678 = vmatpush2.msra.mxu1 %v418_v31  ;;  %v292_v13 = vld [vmem:[%s1944_s28 + $0x20] sm:$0xff]  ;;  %v882_v17 = vld [vmem:[#allocation8 + $0xd0] sm:$0xff]  ;;  %v297_v20 = vld [vmem:[%s1944_s28 + $0x48] sm:$0xff] }
  0x95   : > { %518 = vmatprep.subr.mxu0 %v413_v32  ;;  %679 = vmatprep.subr.mxu1 %v415_v33  ;;  %v947_v16 = vld [vmem:[#allocation8 + $0x2d8] sm:$0xff]  ;;  %v946_v18 = vld [vmem:[#allocation8 + $0x2d0] sm:$0xff]  ;;  %v881_v21 = vld [vmem:[#allocation8 + $0xc8] sm:$0xff] }
  0x96   : > { %519 = vmatpush2.msra.mxu0 %v412_v34  ;;  %680 = vmatpush2.msra.mxu1 %v414_v35  ;;  %v294_v19 = vld [vmem:[%s1944_s28 + $0x30] sm:$0xff]  ;;  %v880_v23 = vld [vmem:[#allocation8 + $0xc0] sm:$0xff]  ;;  %v299_v26 = vld [vmem:[%s1944_s28 + $0x58] sm:$0xff] }
  0x97   : > { %520 = vmatprep.subr.mxu0 %v409_v36  ;;  %681 = vmatprep.subr.mxu1 %v411_v37  ;;  %v945_v22 = vld [vmem:[#allocation8 + $0x2c8] sm:$0xff]  ;;  %v944_v24 = vld [vmem:[#allocation8 + $0x2c0] sm:$0xff]  ;;  %v879_v27 = vld [vmem:[#allocation8 + $0xb8] sm:$0xff] }
  0x98   : > { %521 = vmatpush2.msra.mxu0 %v408_v38  ;;  %682 = vmatpush2.msra.mxu1 %v410_v39  ;;  %v296_v25 = vld [vmem:[%s1944_s28 + $0x40] sm:$0xff]  ;;  %v878_v29 = vld [vmem:[#allocation8 + $0xb0] sm:$0xff]  ;;  %v301_v32 = vld [vmem:[%s1944_s28 + $0x68] sm:$0xff] }
  0x99   : > { %522 = vmatprep.subr.mxu0 %v405_v40  ;;  %683 = vmatprep.subr.mxu1 %v407_v41  ;;  %v943_v28 = vld [vmem:[#allocation8 + $0x2b8] sm:$0xff]  ;;  %v942_v30 = vld [vmem:[#allocation8 + $0x2b0] sm:$0xff]  ;;  %v877_v33 = vld [vmem:[#allocation8 + $0xa8] sm:$0xff] }
  0x9a   : > { %523 = vmatpush2.msra.mxu0 %v404_v42  ;;  %684 = vmatpush2.msra.mxu1 %v406_v43  ;;  %v298_v31 = vld [vmem:[%s1944_s28 + $0x50] sm:$0xff]  ;;  %v876_v35 = vld [vmem:[#allocation8 + $0xa0] sm:$0xff]  ;;  %v303_v38 = vld [vmem:[%s1944_s28 + $0x78] sm:$0xff] }
  0x9b   : > { %524 = vmatprep.subr.mxu0 %v401_v44  ;;  %685 = vmatprep.subr.mxu1 %v403_v45  ;;  %v941_v34 = vld [vmem:[#allocation8 + $0x2a8] sm:$0xff]  ;;  %v940_v36 = vld [vmem:[#allocation8 + $0x2a0] sm:$0xff]  ;;  %v875_v39 = vld [vmem:[#allocation8 + $0x98] sm:$0xff] }
  0x9c   : > { %525 = vmatpush2.msra.mxu0 %v400_v46  ;;  %686 = vmatpush2.msra.mxu1 %v402_v47  ;;  %v300_v37 = vld [vmem:[%s1944_s28 + $0x60] sm:$0xff]  ;;  %v874_v41 = vld [vmem:[#allocation8 + $0x90] sm:$0xff]  ;;  %v305_v44 = vld [vmem:[%s1944_s28 + $0x88] sm:$0xff] }
  0x9d   : > { %526 = vmatprep.subr.mxu0 %v397_v48  ;;  %687 = vmatprep.subr.mxu1 %v399_v49  ;;  %v939_v40 = vld [vmem:[#allocation8 + $0x298] sm:$0xff]  ;;  %v938_v42 = vld [vmem:[#allocation8 + $0x290] sm:$0xff]  ;;  %v873_v45 = vld [vmem:[#allocation8 + $0x88] sm:$0xff] }
  0x9e   : > { %527 = vmatpush2.msra.mxu0 %v396_v50  ;;  %688 = vmatpush2.msra.mxu1 %v398_v51  ;;  %v302_v43 = vld [vmem:[%s1944_s28 + $0x70] sm:$0xff]  ;;  %v872_v47 = vld [vmem:[#allocation8 + $0x80] sm:$0xff]  ;;  %v307_v50 = vld [vmem:[%s1944_s28 + $0x98] sm:$0xff] }
  0x9f   : > { %528 = vmatprep.subr.mxu0 %v393_v52  ;;  %689 = vmatprep.subr.mxu1 %v395_v53  ;;  %v937_v46 = vld [vmem:[#allocation8 + $0x288] sm:$0xff]  ;;  %v936_v48 = vld [vmem:[#allocation8 + $0x280] sm:$0xff]  ;;  %v871_v51 = vld [vmem:[#allocation8 + $0x78] sm:$0xff] }
  0xa0   : > { %529 = vmatpush2.msra.mxu0 %v392_v54  ;;  %690 = vmatpush2.msra.mxu1 %v394_v55  ;;  %v304_v49 = vld [vmem:[%s1944_s28 + $0x80] sm:$0xff]  ;;  %v870_v53 = vld [vmem:[#allocation8 + $0x70] sm:$0xff] }
  0xa1   : > { %530 = vmatprep.subr.mxu0 %v389_v56  ;;  %691 = vmatprep.subr.mxu1 %v391_v57  ;;  %v935_v52 = vld [vmem:[#allocation8 + $0x278] sm:$0xff]  ;;  %v934_v54 = vld [vmem:[#allocation8 + $0x270] sm:$0xff]  ;;  %v309_v56 = vld [vmem:[%s1944_s28 + $0xa8] sm:$0xff] }
  0xa2   : > { %531 = vmatpush2.msra.mxu0 %v388_v58  ;;  %692 = vmatpush2.msra.mxu1 %v390_v59  ;;  %v306_v55 = vld [vmem:[%s1944_s28 + $0x90] sm:$0xff]  ;;  %v868_v59 = vld [vmem:[#allocation8 + $0x60] sm:$0xff] }
  0xa3   : > { %532 = vmatprep.subr.mxu0 %v385_v60  ;;  %693 = vmatprep.subr.mxu1 %v387_v61  ;;  %v869_v57 = vld [vmem:[#allocation8 + $0x68] sm:$0xff]  ;;  %v932_v60 = vld [vmem:[#allocation8 + $0x260] sm:$0xff] }
  0xa4   : > { %533 = vmatpush2.msra.mxu0 %v384_v62  ;;  %534 = vmatprep.mubr.f32.mxu0 %v289_v63  ;;  %v933_v58 = vld [vmem:[#allocation8 + $0x268] sm:$0xff]  ;;  %v308_v61 = vld [vmem:[%s1944_s28 + $0xa0] sm:$0xff]  ;;  %v311_v62 = vld [vmem:[%s1944_s28 + $0xb8] sm:$0xff] }
  0xa5   : > { %694 = vmatpush2.msra.mxu1 %v386_v0  ;;  %695 = vmatprep.mubr.f32.mxu1 %v289_v63  ;;  %v867_v63 = vld [vmem:[#allocation8 + $0x58] sm:$0xff] }
  0xa6   : > { %535 = vmatmul.mubr.f32.vlgmr.msra.gmra.mxu0 %v288_v1  ;;  %696 = vmatmul.mubr.f32.vlgmr.msra.gmra.mxu1 %v288_v1  ;;  %v931_v0 = vld [vmem:[#allocation8 + $0x258] sm:$0xff]  ;;  %v866_v1 = vld [vmem:[#allocation8 + $0x50] sm:$0xff] }
  0xa7   : > { %540 = vmatprep.mubr.f32.mxu0 %v291_v2  ;;  %701 = vmatprep.mubr.f32.mxu1 %v291_v2  ;;  %v930_v2 = vld [vmem:[#allocation8 + $0x250] sm:$0xff] }
  0xa8   : > { %996 = vmatprep.subr.mxu0 %v887_v3  ;;  %1157 = vmatprep.subr.mxu1 %v951_v4  ;;  %v310_v3 = vld [vmem:[%s1944_s28 + $0xb0] sm:$0xff]  ;;  %v313_v4 = vld [vmem:[%s1944_s28 + $0xc8] sm:$0xff] }
  0xa9   : > { %997 = vmatpush1.msra.mxu0 %v886_v5  ;;  %1158 = vmatpush1.msra.mxu1 %v950_v6  ;;  %v865_v5 = vld [vmem:[#allocation8 + $0x48] sm:$0xff] }
  0xaa   : > { %541 = vmatmul.mubr.f32.gmra.mxu0 %v290_v7  ;;  %702 = vmatmul.mubr.f32.gmra.mxu1 %v290_v7  ;;  %v929_v6 = vld [vmem:[#allocation8 + $0x248] sm:$0xff]  ;;  %v864_v7 = vld [vmem:[#allocation8 + $0x40] sm:$0xff] }
  0xab   : > { %546 = vmatprep.mubr.f32.mxu0 %v293_v8  ;;  %707 = vmatprep.mubr.f32.mxu1 %v293_v8  ;;  %v928_v8 = vld [vmem:[#allocation8 + $0x240] sm:$0xff] }
  0xac   : > { %998 = vmatprep.subr.mxu0 %v885_v9  ;;  %1159 = vmatprep.subr.mxu1 %v949_v10  ;;  %v312_v9 = vld [vmem:[%s1944_s28 + $0xc0] sm:$0xff]  ;;  %v315_v10 = vld [vmem:[%s1944_s28 + $0xd8] sm:$0xff] }
  0xad   : > { %999 = vmatpush1.msra.mxu0 %v884_v11  ;;  %1160 = vmatpush1.msra.mxu1 %v948_v12  ;;  %v863_v11 = vld [vmem:[#allocation8 + $0x38] sm:$0xff] }
  0xae   : > { %547 = vmatmul.mubr.f32.gmra.mxu0 %v292_v13  ;;  %708 = vmatmul.mubr.f32.gmra.mxu1 %v292_v13  ;;  %v927_v12 = vld [vmem:[#allocation8 + $0x238] sm:$0xff]  ;;  %v862_v13 = vld [vmem:[#allocation8 + $0x30] sm:$0xff] }
  0xaf   : > { %552 = vmatprep.mubr.f32.mxu0 %v295_v14  ;;  %713 = vmatprep.mubr.f32.mxu1 %v295_v14  ;;  %v926_v14 = vld [vmem:[#allocation8 + $0x230] sm:$0xff] }
  0xb0   : > { %1000 = vmatprep.subr.mxu0 %v883_v15  ;;  %1161 = vmatprep.subr.mxu1 %v947_v16  ;;  %v314_v15 = vld [vmem:[%s1944_s28 + $0xd0] sm:$0xff]  ;;  %v317_v16 = vld [vmem:[%s1944_s28 + $0xe8] sm:$0xff] }
  0xb1   : > { %1001 = vmatpush1.msra.mxu0 %v882_v17  ;;  %1162 = vmatpush1.msra.mxu1 %v946_v18  ;;  %v861_v17 = vld [vmem:[#allocation8 + $0x28] sm:$0xff] }
  0xb2   : > { %553 = vmatmul.mubr.f32.gmra.mxu0 %v294_v19  ;;  %714 = vmatmul.mubr.f32.gmra.mxu1 %v294_v19  ;;  %v925_v18 = vld [vmem:[#allocation8 + $0x228] sm:$0xff]  ;;  %v860_v19 = vld [vmem:[#allocation8 + $0x20] sm:$0xff] }
  0xb3   : > { %558 = vmatprep.mubr.f32.mxu0 %v297_v20  ;;  %719 = vmatprep.mubr.f32.mxu1 %v297_v20  ;;  %v924_v20 = vld [vmem:[#allocation8 + $0x220] sm:$0xff] }
  0xb4   : > { %1002 = vmatprep.subr.mxu0 %v881_v21  ;;  %1163 = vmatprep.subr.mxu1 %v945_v22  ;;  %v316_v21 = vld [vmem:[%s1944_s28 + $0xe0] sm:$0xff]  ;;  %v319_v22 = vld [vmem:[%s1944_s28 + $0xf8] sm:$0xff] }
  0xb5   : > { %1003 = vmatpush1.msra.mxu0 %v880_v23  ;;  %1164 = vmatpush1.msra.mxu1 %v944_v24  ;;  %v859_v23 = vld [vmem:[#allocation8 + $0x18] sm:$0xff] }
  0xb6   : > { %559 = vmatmul.mubr.f32.gmra.mxu0 %v296_v25  ;;  %720 = vmatmul.mubr.f32.gmra.mxu1 %v296_v25  ;;  %v923_v24 = vld [vmem:[#allocation8 + $0x218] sm:$0xff]  ;;  %v858_v25 = vld [vmem:[#allocation8 + $0x10] sm:$0xff] }
  0xb7   : > { %564 = vmatprep.mubr.f32.mxu0 %v299_v26  ;;  %725 = vmatprep.mubr.f32.mxu1 %v299_v26  ;;  %v922_v26 = vld [vmem:[#allocation8 + $0x210] sm:$0xff] }
  0xb8   : > { %1004 = vmatprep.subr.mxu0 %v879_v27  ;;  %1165 = vmatprep.subr.mxu1 %v943_v28  ;;  %v318_v27 = vld [vmem:[%s1944_s28 + $0xf0] sm:$0xff] }
  0xb9   : > { %1005 = vmatpush1.msra.mxu0 %v878_v29  ;;  %1166 = vmatpush1.msra.mxu1 %v942_v30  ;;  %v857_v28 = vld [vmem:[#allocation8 + $0x8] sm:$0xff]  ;;  %v856_v30 = vld [vmem:[#allocation8] sm:$0xff] }
  0xba   : > { %565 = vmatmul.mubr.f32.gmra.mxu0 %v298_v31  ;;  %726 = vmatmul.mubr.f32.gmra.mxu1 %v298_v31  ;;  %v921_v29 = vld [vmem:[#allocation8 + $0x208] sm:$0xff]  ;;  %v920_v31 = vld [vmem:[#allocation8 + $0x200] sm:$0xff] }
  0xbb   : > { %570 = vmatprep.mubr.f32.mxu0 %v301_v32  ;;  %731 = vmatprep.mubr.f32.mxu1 %v301_v32  ;;  %v919_v32 = vld [vmem:[#allocation8 + $0x1f8] sm:$0xff] }
  0xbc   : > { %1006 = vmatprep.subr.mxu0 %v877_v33  ;;  %1167 = vmatprep.subr.mxu1 %v941_v34  ;;  %v983_v33 = vld [vmem:[#allocation8 + $0x3f8] sm:$0xff]  ;;  %v918_v34 = vld [vmem:[#allocation8 + $0x1f0] sm:$0xff] }
  0xbd   : > { %1007 = vmatpush1.msra.mxu0 %v876_v35  ;;  %1168 = vmatpush1.msra.mxu1 %v940_v36  ;;  %v982_v35 = vld [vmem:[#allocation8 + $0x3f0] sm:$0xff]  ;;  %v917_v36 = vld [vmem:[#allocation8 + $0x1e8] sm:$0xff] }
  0xbe   : > { %571 = vmatmul.mubr.f32.gmra.mxu0 %v300_v37  ;;  %732 = vmatmul.mubr.f32.gmra.mxu1 %v300_v37  ;;  %v981_v37 = vld [vmem:[#allocation8 + $0x3e8] sm:$0xff] }
  0xbf   : > { %576 = vmatprep.mubr.f32.mxu0 %v303_v38  ;;  %737 = vmatprep.mubr.f32.mxu1 %v303_v38  ;;  %v916_v38 = vld [vmem:[#allocation8 + $0x1e0] sm:$0xff] }
  0xc0   : > { %1008 = vmatprep.subr.mxu0 %v875_v39  ;;  %1169 = vmatprep.subr.mxu1 %v939_v40  ;;  %v980_v39 = vld [vmem:[#allocation8 + $0x3e0] sm:$0xff]  ;;  %v915_v40 = vld [vmem:[#allocation8 + $0x1d8] sm:$0xff] }
  0xc1   : > { %1009 = vmatpush1.msra.mxu0 %v874_v41  ;;  %1170 = vmatpush1.msra.mxu1 %v938_v42  ;;  %v979_v41 = vld [vmem:[#allocation8 + $0x3d8] sm:$0xff]  ;;  %v914_v42 = vld [vmem:[#allocation8 + $0x1d0] sm:$0xff] }
  0xc2   : > { %577 = vmatmul.mubr.f32.gmra.mxu0 %v302_v43  ;;  %738 = vmatmul.mubr.f32.gmra.mxu1 %v302_v43  ;;  %v978_v43 = vld [vmem:[#allocation8 + $0x3d0] sm:$0xff] }
  0xc3   : > { %582 = vmatprep.mubr.f32.mxu0 %v305_v44  ;;  %743 = vmatprep.mubr.f32.mxu1 %v305_v44  ;;  %v913_v44 = vld [vmem:[#allocation8 + $0x1c8] sm:$0xff] }
  0xc4   : > { %1010 = vmatprep.subr.mxu0 %v873_v45  ;;  %1171 = vmatprep.subr.mxu1 %v937_v46  ;;  %v977_v45 = vld [vmem:[#allocation8 + $0x3c8] sm:$0xff]  ;;  %v912_v46 = vld [vmem:[#allocation8 + $0x1c0] sm:$0xff] }
  0xc5   : > { %1011 = vmatpush1.msra.mxu0 %v872_v47  ;;  %1172 = vmatpush1.msra.mxu1 %v936_v48  ;;  %v976_v47 = vld [vmem:[#allocation8 + $0x3c0] sm:$0xff]  ;;  %v911_v48 = vld [vmem:[#allocation8 + $0x1b8] sm:$0xff] }
  0xc6   : > { %583 = vmatmul.mubr.f32.gmra.mxu0 %v304_v49  ;;  %744 = vmatmul.mubr.f32.gmra.mxu1 %v304_v49  ;;  %v975_v49 = vld [vmem:[#allocation8 + $0x3b8] sm:$0xff] }
  0xc7   : > { %588 = vmatprep.mubr.f32.mxu0 %v307_v50  ;;  %749 = vmatprep.mubr.f32.mxu1 %v307_v50  ;;  %v910_v50 = vld [vmem:[#allocation8 + $0x1b0] sm:$0xff] }
  0xc8   : > { %1012 = vmatprep.subr.mxu0 %v871_v51  ;;  %1173 = vmatprep.subr.mxu1 %v935_v52  ;;  %v974_v51 = vld [vmem:[#allocation8 + $0x3b0] sm:$0xff]  ;;  %v909_v52 = vld [vmem:[#allocation8 + $0x1a8] sm:$0xff] }
  0xc9   : > { %1013 = vmatpush1.msra.mxu0 %v870_v53  ;;  %1174 = vmatpush1.msra.mxu1 %v934_v54  ;;  %v973_v53 = vld [vmem:[#allocation8 + $0x3a8] sm:$0xff]  ;;  %v908_v54 = vld [vmem:[#allocation8 + $0x1a0] sm:$0xff] }
  0xca   : > { %589 = vmatmul.mubr.f32.gmra.mxu0 %v306_v55  ;;  %750 = vmatmul.mubr.f32.gmra.mxu1 %v306_v55  ;;  %v972_v55 = vld [vmem:[#allocation8 + $0x3a0] sm:$0xff] }
  0xcb   : > { %594 = vmatprep.mubr.f32.mxu0 %v309_v56  ;;  %755 = vmatprep.mubr.f32.mxu1 %v309_v56  ;;  %v907_v56 = vld [vmem:[#allocation8 + $0x198] sm:$0xff] }
  0xcc   : > { %1014 = vmatprep.subr.mxu0 %v869_v57  ;;  %1175 = vmatprep.subr.mxu1 %v933_v58  ;;  %v971_v57 = vld [vmem:[#allocation8 + $0x398] sm:$0xff]  ;;  %v906_v58 = vld [vmem:[#allocation8 + $0x190] sm:$0xff] }
  0xcd   : > { %1015 = vmatpush1.msra.mxu0 %v868_v59  ;;  %1176 = vmatpush1.msra.mxu1 %v932_v60  ;;  %v970_v59 = vld [vmem:[#allocation8 + $0x390] sm:$0xff]  ;;  %v905_v60 = vld [vmem:[#allocation8 + $0x188] sm:$0xff] }
  0xce   : > { %595 = vmatmul.mubr.f32.gmra.mxu0 %v308_v61  ;;  %756 = vmatmul.mubr.f32.gmra.mxu1 %v308_v61  ;;  %v969_v61 = vld [vmem:[#allocation8 + $0x388] sm:$0xff] }
  0xcf   : > { %600 = vmatprep.mubr.f32.mxu0 %v311_v62  ;;  %761 = vmatprep.mubr.f32.mxu1 %v311_v62  ;;  %v904_v62 = vld [vmem:[#allocation8 + $0x180] sm:$0xff] }
  0xd0   : > { %1016 = vmatprep.subr.mxu0 %v867_v63  ;;  %1177 = vmatprep.subr.mxu1 %v931_v0  ;;  %v968_v63 = vld [vmem:[#allocation8 + $0x380] sm:$0xff]  ;;  %v903_v0 = vld [vmem:[#allocation8 + $0x178] sm:$0xff] }
  0xd1   : > { %1017 = vmatpush1.msra.mxu0 %v866_v1  ;;  %1178 = vmatpush1.msra.mxu1 %v930_v2  ;;  %v967_v1 = vld [vmem:[#allocation8 + $0x378] sm:$0xff]  ;;  %v902_v2 = vld [vmem:[#allocation8 + $0x170] sm:$0xff] }
  0xd2   : > { %601 = vmatmul.mubr.f32.gmra.mxu0 %v310_v3  ;;  %762 = vmatmul.mubr.f32.gmra.mxu1 %v310_v3  ;;  %v966_v3 = vld [vmem:[#allocation8 + $0x370] sm:$0xff] }
  0xd3   : > { %606 = vmatprep.mubr.f32.mxu0 %v313_v4  ;;  %767 = vmatprep.mubr.f32.mxu1 %v313_v4  ;;  %v901_v4 = vld [vmem:[#allocation8 + $0x168] sm:$0xff] }
  0xd4   : > { %1018 = vmatprep.subr.mxu0 %v865_v5  ;;  %1179 = vmatprep.subr.mxu1 %v929_v6  ;;  %v965_v5 = vld [vmem:[#allocation8 + $0x368] sm:$0xff]  ;;  %v900_v6 = vld [vmem:[#allocation8 + $0x160] sm:$0xff] }
  0xd5   : > { %1019 = vmatpush1.msra.mxu0 %v864_v7  ;;  %1180 = vmatpush1.msra.mxu1 %v928_v8  ;;  %v964_v7 = vld [vmem:[#allocation8 + $0x360] sm:$0xff]  ;;  %v899_v8 = vld [vmem:[#allocation8 + $0x158] sm:$0xff] }
  0xd6   : > { %607 = vmatmul.mubr.f32.gmra.mxu0 %v312_v9  ;;  %768 = vmatmul.mubr.f32.gmra.mxu1 %v312_v9  ;;  %v963_v9 = vld [vmem:[#allocation8 + $0x358] sm:$0xff] }
  0xd7   : > { %612 = vmatprep.mubr.f32.mxu0 %v315_v10  ;;  %773 = vmatprep.mubr.f32.mxu1 %v315_v10  ;;  %v898_v10 = vld [vmem:[#allocation8 + $0x150] sm:$0xff] }
  0xd8   : > { %1020 = vmatprep.subr.mxu0 %v863_v11  ;;  %1181 = vmatprep.subr.mxu1 %v927_v12  ;;  %v962_v11 = vld [vmem:[#allocation8 + $0x350] sm:$0xff]  ;;  %v897_v12 = vld [vmem:[#allocation8 + $0x148] sm:$0xff] }
  0xd9   : > { %1021 = vmatpush1.msra.mxu0 %v862_v13  ;;  %1182 = vmatpush1.msra.mxu1 %v926_v14  ;;  %v961_v13 = vld [vmem:[#allocation8 + $0x348] sm:$0xff]  ;;  %v896_v14 = vld [vmem:[#allocation8 + $0x140] sm:$0xff] }
  0xda   : > { %613 = vmatmul.mubr.f32.gmra.mxu0 %v314_v15  ;;  %774 = vmatmul.mubr.f32.gmra.mxu1 %v314_v15  ;;  %v960_v15 = vld [vmem:[#allocation8 + $0x340] sm:$0xff] }
  0xdb   : > { %618 = vmatprep.mubr.f32.mxu0 %v317_v16  ;;  %779 = vmatprep.mubr.f32.mxu1 %v317_v16  ;;  %v895_v16 = vld [vmem:[#allocation8 + $0x138] sm:$0xff] }
  0xdc   : > { %1022 = vmatprep.subr.mxu0 %v861_v17  ;;  %1183 = vmatprep.subr.mxu1 %v925_v18  ;;  %v959_v17 = vld [vmem:[#allocation8 + $0x338] sm:$0xff]  ;;  %v894_v18 = vld [vmem:[#allocation8 + $0x130] sm:$0xff] }
  0xdd   : > { %1023 = vmatpush1.msra.mxu0 %v860_v19  ;;  %1184 = vmatpush1.msra.mxu1 %v924_v20  ;;  %v958_v19 = vld [vmem:[#allocation8 + $0x330] sm:$0xff]  ;;  %v893_v20 = vld [vmem:[#allocation8 + $0x128] sm:$0xff] }
  0xde   : > { %619 = vmatmul.mubr.f32.gmra.mxu0 %v316_v21  ;;  %780 = vmatmul.mubr.f32.gmra.mxu1 %v316_v21  ;;  %v957_v21 = vld [vmem:[#allocation8 + $0x328] sm:$0xff] }
  0xdf   : > { %624 = vmatprep.mubr.f32.mxu0 %v319_v22  ;;  %785 = vmatprep.mubr.f32.mxu1 %v319_v22  ;;  %v892_v22 = vld [vmem:[#allocation8 + $0x120] sm:$0xff] }
  0xe0   : > { %1024 = vmatprep.subr.mxu0 %v859_v23  ;;  %1185 = vmatprep.subr.mxu1 %v923_v24  ;;  %v956_v23 = vld [vmem:[#allocation8 + $0x320] sm:$0xff]  ;;  %v891_v24 = vld [vmem:[#allocation8 + $0x118] sm:$0xff] }
  0xe1   : > { %1025 = vmatpush1.msra.mxu0 %v858_v25  ;;  %1186 = vmatpush1.msra.mxu1 %v922_v26  ;;  %v955_v25 = vld [vmem:[#allocation8 + $0x318] sm:$0xff]  ;;  %v890_v26 = vld [vmem:[#allocation8 + $0x110] sm:$0xff] }
  0xe2   : > { %625 = vmatmul.mubr.f32.gmra.mxu0 %v318_v27  ;;  %786 = vmatmul.mubr.f32.gmra.mxu1 %v318_v27  ;;  %v954_v27 = vld [vmem:[#allocation8 + $0x310] sm:$0xff] }
  0xe3   : > { %1026 = vmatprep.subr.mxu0 %v857_v28  ;;  %1187 = vmatprep.subr.mxu1 %v921_v29  ;;  %v889_v28 = vld [vmem:[#allocation8 + $0x108] sm:$0xff] }
  0xe4   : > { %1027 = vmatpush1.msra.mxu0 %v856_v30  ;;  %1188 = vmatpush1.msra.mxu1 %v920_v31  ;;  %v953_v29 = vld [vmem:[#allocation8 + $0x308] sm:$0xff]  ;;  %v888_v30 = vld [vmem:[#allocation8 + $0x100] sm:$0xff] }
  0xe5   : > { %1028 = vmatprep.subr.mxu0 %v919_v32  ;;  %1189 = vmatprep.subr.mxu1 %v983_v33  ;;  %v952_v31 = vld [vmem:[#allocation8 + $0x300] sm:$0xff]  ;;  %v450_v32 = vlaneseq }
  0xe6   : > { %1029 = vmatpush2.msra.mxu0 %v918_v34  ;;  %1190 = vmatpush2.msra.mxu1 %v982_v35 }
  0xe7   : > { %1030 = vmatprep.subr.mxu0 %v917_v36  ;;  %1191 = vmatprep.subr.mxu1 %v981_v37  ;;  %v1990_v33 = vshrl.u32 %v450_v32, 7  ;;  %v448_v36 = vld [vmem:[#allocation7] sm:$0xf] }
  0xe8   : > { %1031 = vmatpush2.msra.mxu0 %v916_v38  ;;  %1192 = vmatpush2.msra.mxu1 %v980_v39 }
  0xe9   : > { %1032 = vmatprep.subr.mxu0 %v915_v40  ;;  %1193 = vmatprep.subr.mxu1 %v979_v41  ;;  %v460_v34 = vsub.s32 2, %v1990_v33  ;;  %v452_v35 = vsub.s32 0, %v1990_v33  ;;  %v456_v37 = vsub.s32 1, %v1990_v33  ;;  %v464_v38 = vsub.s32 3, %v1990_v33 }
  0xea   : > { %1033 = vmatpush2.msra.mxu0 %v914_v42  ;;  %1194 = vmatpush2.msra.mxu1 %v978_v43 }
  0xeb   : > { %1034 = vmatprep.subr.mxu0 %v913_v44  ;;  %1195 = vmatprep.subr.mxu1 %v977_v45  ;;  %v1996_v39 = vrot.slane %v448_v36, %v460_v34  ;;  %v2000_v40 = vrot.slane %v448_v36, %v452_v35  ;;  %v2004_v41 = vrot.slane %v448_v36, %v456_v37 }
  0xec   : > { %1035 = vmatpush2.msra.mxu0 %v912_v46  ;;  %1196 = vmatpush2.msra.mxu1 %v976_v47  ;;  %v2006_v42 = vrot.slane %v448_v36, %v464_v38 }
  0xed   : > { %1036 = vmatprep.subr.mxu0 %v911_v48  ;;  %1197 = vmatprep.subr.mxu1 %v975_v49 }
  0xee   : > { %1037 = vmatpush2.msra.mxu0 %v910_v50  ;;  %1198 = vmatpush2.msra.mxu1 %v974_v51 }
  0xef   : > { %1038 = vmatprep.subr.mxu0 %v909_v52  ;;  %1199 = vmatprep.subr.mxu1 %v973_v53 }
  0xf0   : > { %1039 = vmatpush2.msra.mxu0 %v908_v54  ;;  %1200 = vmatpush2.msra.mxu1 %v972_v55 }
  0xf1   : > { %1040 = vmatprep.subr.mxu0 %v907_v56  ;;  %1201 = vmatprep.subr.mxu1 %v971_v57 }
  0xf2   : > { %1041 = vmatpush2.msra.mxu0 %v906_v58  ;;  %1202 = vmatpush2.msra.mxu1 %v970_v59 }
  0xf3   : > { %1042 = vmatprep.subr.mxu0 %v905_v60  ;;  %1203 = vmatprep.subr.mxu1 %v969_v61 }
  0xf4   : > { %1043 = vmatpush2.msra.mxu0 %v904_v62  ;;  %1204 = vmatpush2.msra.mxu1 %v968_v63 }
  0xf5   : > { %1044 = vmatprep.subr.mxu0 %v903_v0  ;;  %1205 = vmatprep.subr.mxu1 %v967_v1 }
  0xf6   : > { %1045 = vmatpush2.msra.mxu0 %v902_v2  ;;  %1206 = vmatpush2.msra.mxu1 %v966_v3 }
  0xf7   : > { %1046 = vmatprep.subr.mxu0 %v901_v4  ;;  %1207 = vmatprep.subr.mxu1 %v965_v5 }
  0xf8   : > { %1047 = vmatpush2.msra.mxu0 %v900_v6  ;;  %1208 = vmatpush2.msra.mxu1 %v964_v7 }
  0xf9   : > { %1048 = vmatprep.subr.mxu0 %v899_v8  ;;  %1209 = vmatprep.subr.mxu1 %v963_v9 }
  0xfa   : > { %1049 = vmatpush2.msra.mxu0 %v898_v10  ;;  %1210 = vmatpush2.msra.mxu1 %v962_v11 }
  0xfb   : > { %1050 = vmatprep.subr.mxu0 %v897_v12  ;;  %1211 = vmatprep.subr.mxu1 %v961_v13 }
  0xfc   : > { %1051 = vmatpush2.msra.mxu0 %v896_v14  ;;  %1212 = vmatpush2.msra.mxu1 %v960_v15 }
  0xfd   : > { %1052 = vmatprep.subr.mxu0 %v895_v16  ;;  %1213 = vmatprep.subr.mxu1 %v959_v17 }
  0xfe   : > { %1053 = vmatpush2.msra.mxu0 %v894_v18  ;;  %1214 = vmatpush2.msra.mxu1 %v958_v19 }
  0xff   : > { %1054 = vmatprep.subr.mxu0 %v893_v20  ;;  %1215 = vmatprep.subr.mxu1 %v957_v21 }
 0x100   : > { %1055 = vmatpush2.msra.mxu0 %v892_v22  ;;  %1216 = vmatpush2.msra.mxu1 %v956_v23 }
 0x101   : > { %1056 = vmatprep.subr.mxu0 %v891_v24  ;;  %1217 = vmatprep.subr.mxu1 %v955_v25 }
 0x102   : > { %1057 = vmatpush2.msra.mxu0 %v890_v26  ;;  %1218 = vmatpush2.msra.mxu1 %v954_v27 }
 0x103   : > { %1058 = vmatprep.subr.mxu0 %v889_v28  ;;  %1219 = vmatprep.subr.mxu1 %v953_v29 }
 0x104   : > { %1059 = vmatpush2.msra.mxu0 %v888_v30  ;;  %1220 = vmatpush2.msra.mxu1 %v952_v31 }
 0x166   : > { %v536_v43 = vpop.f32.mrf.mxu0  ;;  %v697_v44 = vpop.f32.mrf.mxu1 }
 0x167   : > { %v698_v45 = vadd.f32 %v697_v44, %v1996_v39  ;;  %v537_v46 = vadd.f32 %v536_v43, %v2000_v40 }
 0x168   : > { %v538_v47 = vpop.f32.mrf.mxu0  ;;  %v699_v48 = vpop.f32.mrf.mxu1 }
 0x169   : > { %v539_v49 = vadd.f32 %v538_v47, %v2004_v41  ;;  %v700_v50 = vadd.f32 %v699_v48, %v2006_v42  ;;  %v794_v51 = vmax.f32 %v698_v45, 0.0  ;;  %v792_v57 = vmax.f32 %v537_v46, 0.0 }
 0x16a   : > { %v542_v52 = vpop.f32.mrf.mxu0  ;;  %v703_v53 = vpop.f32.mrf.mxu1 }
 0x16b   : > { %v793_v54 = vmax.f32 %v539_v49, 0.0  ;;  %v795_v55 = vmax.f32 %v700_v50, 0.0  ;;  %v704_v56 = vadd.f32 %v703_v53, %v1996_v39  ;;  %v543_v58 = vadd.f32 %v542_v52, %v2000_v40 }
 0x16c   : > { %v544_v59 = vpop.f32.mrf.mxu0  ;;  %v705_v60 = vpop.f32.mrf.mxu1 }
 0x16d   : > { %v545_v61 = vadd.f32 %v544_v59, %v2004_v41  ;;  %v706_v62 = vadd.f32 %v705_v60, %v2006_v42  ;;  %1060 = vmatprep.mubr.f32.mxu0 %v793_v54  ;;  %1221 = vmatprep.mubr.f32.mxu1 %v795_v55  ;;  %v798_v63 = vmax.f32 %v704_v56, 0.0  ;;  %v796_v5 = vmax.f32 %v543_v58, 0.0 }
 0x16e   : > { %v548_v0 = vpop.f32.mrf.mxu0  ;;  %v709_v1 = vpop.f32.mrf.mxu1  ;;  %1061 = vmatmul.mubr.f32.vlgmr.msra.gmra.mxu0 %v792_v57  ;;  %1222 = vmatmul.mubr.f32.vlgmr.msra.gmra.mxu1 %v794_v51 }
 0x16f   : > { %v797_v2 = vmax.f32 %v545_v61, 0.0  ;;  %v799_v3 = vmax.f32 %v706_v62, 0.0  ;;  %v710_v4 = vadd.f32 %v709_v1, %v1996_v39  ;;  %v549_v6 = vadd.f32 %v548_v0, %v2000_v40 }
 0x170   : > { %v550_v7 = vpop.f32.mrf.mxu0  ;;  %v711_v8 = vpop.f32.mrf.mxu1 }
 0x171   : > { %v551_v9 = vadd.f32 %v550_v7, %v2004_v41  ;;  %v712_v10 = vadd.f32 %v711_v8, %v2006_v42  ;;  %1066 = vmatprep.mubr.f32.mxu0 %v797_v2  ;;  %1227 = vmatprep.mubr.f32.mxu1 %v799_v3  ;;  %v802_v11 = vmax.f32 %v710_v4, 0.0  ;;  %v800_v17 = vmax.f32 %v549_v6, 0.0 }
 0x172   : > { %v554_v12 = vpop.f32.mrf.mxu0  ;;  %v715_v13 = vpop.f32.mrf.mxu1  ;;  %1067 = vmatmul.mubr.f32.gmra.mxu0 %v796_v5  ;;  %1228 = vmatmul.mubr.f32.gmra.mxu1 %v798_v63 }
 0x173   : > { %v801_v14 = vmax.f32 %v551_v9, 0.0  ;;  %v803_v15 = vmax.f32 %v712_v10, 0.0  ;;  %v716_v16 = vadd.f32 %v715_v13, %v1996_v39  ;;  %v555_v18 = vadd.f32 %v554_v12, %v2000_v40 }
 0x174   : > { %v556_v19 = vpop.f32.mrf.mxu0  ;;  %v717_v20 = vpop.f32.mrf.mxu1 }
 0x175   : > { %v557_v21 = vadd.f32 %v556_v19, %v2004_v41  ;;  %v718_v22 = vadd.f32 %v717_v20, %v2006_v42  ;;  %1072 = vmatprep.mubr.f32.mxu0 %v801_v14  ;;  %1233 = vmatprep.mubr.f32.mxu1 %v803_v15  ;;  %v806_v23 = vmax.f32 %v716_v16, 0.0  ;;  %v804_v29 = vmax.f32 %v555_v18, 0.0 }
 0x176   : > { %v560_v24 = vpop.f32.mrf.mxu0  ;;  %v721_v25 = vpop.f32.mrf.mxu1  ;;  %1073 = vmatmul.mubr.f32.gmra.mxu0 %v800_v17  ;;  %1234 = vmatmul.mubr.f32.gmra.mxu1 %v802_v11 }
 0x177   : > { %v805_v26 = vmax.f32 %v557_v21, 0.0  ;;  %v807_v27 = vmax.f32 %v718_v22, 0.0  ;;  %v722_v28 = vadd.f32 %v721_v25, %v1996_v39  ;;  %v561_v30 = vadd.f32 %v560_v24, %v2000_v40 }
 0x178   : > { %v562_v31 = vpop.f32.mrf.mxu0  ;;  %v723_v32 = vpop.f32.mrf.mxu1 }
 0x179   : > { %v563_v34 = vadd.f32 %v562_v31, %v2004_v41  ;;  %v724_v36 = vadd.f32 %v723_v32, %v2006_v42  ;;  %1078 = vmatprep.mubr.f32.mxu0 %v805_v26  ;;  %1239 = vmatprep.mubr.f32.mxu1 %v807_v27  ;;  %v810_v38 = vmax.f32 %v722_v28, 0.0  ;;  %v808_v48 = vmax.f32 %v561_v30, 0.0 }
 0x17a   : > { %v566_v43 = vpop.f32.mrf.mxu0  ;;  %v727_v44 = vpop.f32.mrf.mxu1  ;;  %1079 = vmatmul.mubr.f32.gmra.mxu0 %v804_v29  ;;  %1240 = vmatmul.mubr.f32.gmra.mxu1 %v806_v23 }
 0x17b   : > { %v809_v45 = vmax.f32 %v563_v34, 0.0  ;;  %v811_v46 = vmax.f32 %v724_v36, 0.0  ;;  %v728_v47 = vadd.f32 %v727_v44, %v1996_v39  ;;  %v567_v49 = vadd.f32 %v566_v43, %v2000_v40 }
 0x17c   : > { %v568_v50 = vpop.f32.mrf.mxu0  ;;  %v729_v51 = vpop.f32.mrf.mxu1 }
 0x17d   : > { %v569_v52 = vadd.f32 %v568_v50, %v2004_v41  ;;  %v730_v53 = vadd.f32 %v729_v51, %v2006_v42  ;;  %1084 = vmatprep.mubr.f32.mxu0 %v809_v45  ;;  %1245 = vmatprep.mubr.f32.mxu1 %v811_v46  ;;  %v814_v54 = vmax.f32 %v728_v47, 0.0  ;;  %v812_v60 = vmax.f32 %v567_v49, 0.0 }
 0x17e   : > { %v572_v55 = vpop.f32.mrf.mxu0  ;;  %v733_v56 = vpop.f32.mrf.mxu1  ;;  %1085 = vmatmul.mubr.f32.gmra.mxu0 %v808_v48  ;;  %1246 = vmatmul.mubr.f32.gmra.mxu1 %v810_v38 }
 0x17f   : > { %v813_v57 = vmax.f32 %v569_v52, 0.0  ;;  %v815_v58 = vmax.f32 %v730_v53, 0.0  ;;  %v734_v59 = vadd.f32 %v733_v56, %v1996_v39  ;;  %v573_v61 = vadd.f32 %v572_v55, %v2000_v40 }
 0x180   : > { %v574_v62 = vpop.f32.mrf.mxu0  ;;  %v735_v63 = vpop.f32.mrf.mxu1 }
 0x181   : > { %v575_v0 = vadd.f32 %v574_v62, %v2004_v41  ;;  %v736_v1 = vadd.f32 %v735_v63, %v2006_v42  ;;  %1090 = vmatprep.mubr.f32.mxu0 %v813_v57  ;;  %1251 = vmatprep.mubr.f32.mxu1 %v815_v58  ;;  %v818_v2 = vmax.f32 %v734_v59, 0.0  ;;  %v816_v8 = vmax.f32 %v573_v61, 0.0 }
 0x182   : > { %v578_v3 = vpop.f32.mrf.mxu0  ;;  %v739_v4 = vpop.f32.mrf.mxu1  ;;  %1091 = vmatmul.mubr.f32.gmra.mxu0 %v812_v60  ;;  %1252 = vmatmul.mubr.f32.gmra.mxu1 %v814_v54 }
 0x183   : > { %v817_v5 = vmax.f32 %v575_v0, 0.0  ;;  %v819_v6 = vmax.f32 %v736_v1, 0.0  ;;  %v740_v7 = vadd.f32 %v739_v4, %v1996_v39  ;;  %v579_v9 = vadd.f32 %v578_v3, %v2000_v40 }
 0x184   : > { %v580_v10 = vpop.f32.mrf.mxu0  ;;  %v741_v11 = vpop.f32.mrf.mxu1 }
 0x185   : > { %v581_v12 = vadd.f32 %v580_v10, %v2004_v41  ;;  %v742_v13 = vadd.f32 %v741_v11, %v2006_v42  ;;  %1096 = vmatprep.mubr.f32.mxu0 %v817_v5  ;;  %1257 = vmatprep.mubr.f32.mxu1 %v819_v6  ;;  %v822_v14 = vmax.f32 %v740_v7, 0.0  ;;  %v820_v20 = vmax.f32 %v579_v9, 0.0 }
 0x186   : > { %v584_v15 = vpop.f32.mrf.mxu0  ;;  %v745_v16 = vpop.f32.mrf.mxu1  ;;  %1097 = vmatmul.mubr.f32.gmra.mxu0 %v816_v8  ;;  %1258 = vmatmul.mubr.f32.gmra.mxu1 %v818_v2 }
 0x187   : > { %v821_v17 = vmax.f32 %v581_v12, 0.0  ;;  %v823_v18 = vmax.f32 %v742_v13, 0.0  ;;  %v746_v19 = vadd.f32 %v745_v16, %v1996_v39  ;;  %v585_v21 = vadd.f32 %v584_v15, %v2000_v40 }
 0x188   : > { %v586_v22 = vpop.f32.mrf.mxu0  ;;  %v747_v23 = vpop.f32.mrf.mxu1 }
 0x189   : > { %v587_v24 = vadd.f32 %v586_v22, %v2004_v41  ;;  %v748_v25 = vadd.f32 %v747_v23, %v2006_v42  ;;  %1102 = vmatprep.mubr.f32.mxu0 %v821_v17  ;;  %1263 = vmatprep.mubr.f32.mxu1 %v823_v18  ;;  %v826_v26 = vmax.f32 %v746_v19, 0.0  ;;  %v824_v32 = vmax.f32 %v585_v21, 0.0 }
 0x18a   : > { %v590_v27 = vpop.f32.mrf.mxu0  ;;  %v751_v28 = vpop.f32.mrf.mxu1  ;;  %1103 = vmatmul.mubr.f32.gmra.mxu0 %v820_v20  ;;  %1264 = vmatmul.mubr.f32.gmra.mxu1 %v822_v14 }
 0x18b   : > { %v825_v29 = vmax.f32 %v587_v24, 0.0  ;;  %v827_v30 = vmax.f32 %v748_v25, 0.0  ;;  %v752_v31 = vadd.f32 %v751_v28, %v1996_v39  ;;  %v591_v34 = vadd.f32 %v590_v27, %v2000_v40 }
 0x18c   : > { %v592_v36 = vpop.f32.mrf.mxu0  ;;  %v753_v38 = vpop.f32.mrf.mxu1 }
 0x18d   : > { %v593_v43 = vadd.f32 %v592_v36, %v2004_v41  ;;  %v754_v44 = vadd.f32 %v753_v38, %v2006_v42  ;;  %1108 = vmatprep.mubr.f32.mxu0 %v825_v29  ;;  %1269 = vmatprep.mubr.f32.mxu1 %v827_v30  ;;  %v830_v45 = vmax.f32 %v752_v31, 0.0  ;;  %v828_v51 = vmax.f32 %v591_v34, 0.0 }
 0x18e   : > { %v596_v46 = vpop.f32.mrf.mxu0  ;;  %v757_v47 = vpop.f32.mrf.mxu1  ;;  %1109 = vmatmul.mubr.f32.gmra.mxu0 %v824_v32  ;;  %1270 = vmatmul.mubr.f32.gmra.mxu1 %v826_v26 }
 0x18f   : > { %v829_v48 = vmax.f32 %v593_v43, 0.0  ;;  %v831_v49 = vmax.f32 %v754_v44, 0.0  ;;  %v758_v50 = vadd.f32 %v757_v47, %v1996_v39  ;;  %v597_v52 = vadd.f32 %v596_v46, %v2000_v40 }
 0x190   : > { %v598_v53 = vpop.f32.mrf.mxu0  ;;  %v759_v54 = vpop.f32.mrf.mxu1 }
 0x191   : > { %v599_v55 = vadd.f32 %v598_v53, %v2004_v41  ;;  %v760_v56 = vadd.f32 %v759_v54, %v2006_v42  ;;  %1114 = vmatprep.mubr.f32.mxu0 %v829_v48  ;;  %1275 = vmatprep.mubr.f32.mxu1 %v831_v49  ;;  %v834_v57 = vmax.f32 %v758_v50, 0.0  ;;  %v832_v63 = vmax.f32 %v597_v52, 0.0 }
 0x192   : > { %v602_v58 = vpop.f32.mrf.mxu0  ;;  %v763_v59 = vpop.f32.mrf.mxu1  ;;  %1115 = vmatmul.mubr.f32.gmra.mxu0 %v828_v51  ;;  %1276 = vmatmul.mubr.f32.gmra.mxu1 %v830_v45 }
 0x193   : > { %v833_v60 = vmax.f32 %v599_v55, 0.0  ;;  %v835_v61 = vmax.f32 %v760_v56, 0.0  ;;  %v764_v62 = vadd.f32 %v763_v59, %v1996_v39  ;;  %v603_v0 = vadd.f32 %v602_v58, %v2000_v40 }
 0x194   : > { %v604_v1 = vpop.f32.mrf.mxu0  ;;  %v765_v2 = vpop.f32.mrf.mxu1 }
 0x195   : > { %v605_v3 = vadd.f32 %v604_v1, %v2004_v41  ;;  %v766_v4 = vadd.f32 %v765_v2, %v2006_v42  ;;  %1120 = vmatprep.mubr.f32.mxu0 %v833_v60  ;;  %1281 = vmatprep.mubr.f32.mxu1 %v835_v61  ;;  %v838_v5 = vmax.f32 %v764_v62, 0.0  ;;  %v836_v11 = vmax.f32 %v603_v0, 0.0 }
 0x196   : > { %v608_v6 = vpop.f32.mrf.mxu0  ;;  %v769_v7 = vpop.f32.mrf.mxu1  ;;  %1121 = vmatmul.mubr.f32.gmra.mxu0 %v832_v63  ;;  %1282 = vmatmul.mubr.f32.gmra.mxu1 %v834_v57 }
 0x197   : > { %v837_v8 = vmax.f32 %v605_v3, 0.0  ;;  %v839_v9 = vmax.f32 %v766_v4, 0.0  ;;  %v770_v10 = vadd.f32 %v769_v7, %v1996_v39  ;;  %v609_v12 = vadd.f32 %v608_v6, %v2000_v40 }
 0x198   : > { %v610_v13 = vpop.f32.mrf.mxu0  ;;  %v771_v14 = vpop.f32.mrf.mxu1 }
 0x199   : > { %v611_v15 = vadd.f32 %v610_v13, %v2004_v41  ;;  %v772_v16 = vadd.f32 %v771_v14, %v2006_v42  ;;  %1126 = vmatprep.mubr.f32.mxu0 %v837_v8  ;;  %1287 = vmatprep.mubr.f32.mxu1 %v839_v9  ;;  %v842_v17 = vmax.f32 %v770_v10, 0.0  ;;  %v840_v23 = vmax.f32 %v609_v12, 0.0 }
 0x19a   : > { %v614_v18 = vpop.f32.mrf.mxu0  ;;  %v775_v19 = vpop.f32.mrf.mxu1  ;;  %1127 = vmatmul.mubr.f32.gmra.mxu0 %v836_v11  ;;  %1288 = vmatmul.mubr.f32.gmra.mxu1 %v838_v5 }
 0x19b   : > { %v841_v20 = vmax.f32 %v611_v15, 0.0  ;;  %v843_v21 = vmax.f32 %v772_v16, 0.0  ;;  %v776_v22 = vadd.f32 %v775_v19, %v1996_v39  ;;  %v615_v24 = vadd.f32 %v614_v18, %v2000_v40 }
 0x19c   : > { %v616_v25 = vpop.f32.mrf.mxu0  ;;  %v777_v26 = vpop.f32.mrf.mxu1 }
 0x19d   : > { %v617_v27 = vadd.f32 %v616_v25, %v2004_v41  ;;  %v778_v28 = vadd.f32 %v777_v26, %v2006_v42  ;;  %1132 = vmatprep.mubr.f32.mxu0 %v841_v20  ;;  %1293 = vmatprep.mubr.f32.mxu1 %v843_v21  ;;  %v846_v29 = vmax.f32 %v776_v22, 0.0  ;;  %v844_v38 = vmax.f32 %v615_v24, 0.0 }
 0x19e   : > { %v620_v30 = vpop.f32.mrf.mxu0  ;;  %v781_v31 = vpop.f32.mrf.mxu1  ;;  %1133 = vmatmul.mubr.f32.gmra.mxu0 %v840_v23  ;;  %1294 = vmatmul.mubr.f32.gmra.mxu1 %v842_v17 }
 0x19f   : > { %v845_v32 = vmax.f32 %v617_v27, 0.0  ;;  %v847_v34 = vmax.f32 %v778_v28, 0.0  ;;  %v782_v36 = vadd.f32 %v781_v31, %v1996_v39  ;;  %v621_v43 = vadd.f32 %v620_v30, %v2000_v40 }
 0x1a0   : > { %v622_v44 = vpop.f32.mrf.mxu0  ;;  %v783_v45 = vpop.f32.mrf.mxu1 }
 0x1a1   : > { %v623_v46 = vadd.f32 %v622_v44, %v2004_v41  ;;  %v784_v47 = vadd.f32 %v783_v45, %v2006_v42  ;;  %1138 = vmatprep.mubr.f32.mxu0 %v845_v32  ;;  %1299 = vmatprep.mubr.f32.mxu1 %v847_v34  ;;  %v850_v48 = vmax.f32 %v782_v36, 0.0  ;;  %v848_v54 = vmax.f32 %v621_v43, 0.0 }
 0x1a2   : > { %v626_v49 = vpop.f32.mrf.mxu0  ;;  %v787_v50 = vpop.f32.mrf.mxu1  ;;  %1139 = vmatmul.mubr.f32.gmra.mxu0 %v844_v38  ;;  %1300 = vmatmul.mubr.f32.gmra.mxu1 %v846_v29 }
 0x1a3   : > { %v849_v51 = vmax.f32 %v623_v46, 0.0  ;;  %v851_v52 = vmax.f32 %v784_v47, 0.0  ;;  %v788_v53 = vadd.f32 %v787_v50, %v1996_v39  ;;  %v627_v55 = vadd.f32 %v626_v49, %v2000_v40  ;;  %v984_v39 = vld [vmem:[%s2205_s4] sm:$0x3] }
 0x1a4   : > { %v628_v56 = vpop.f32.mrf.mxu0  ;;  %v789_v57 = vpop.f32.mrf.mxu1  ;;  %v2077_v40 = vrot.slane %v984_v39, %v452_v35 }
 0x1a5   : > { %v629_v58 = vadd.f32 %v628_v56, %v2004_v41  ;;  %v790_v59 = vadd.f32 %v789_v57, %v2006_v42  ;;  %1144 = vmatprep.mubr.f32.mxu0 %v849_v51  ;;  %1305 = vmatprep.mubr.f32.mxu1 %v851_v52  ;;  %v854_v60 = vmax.f32 %v788_v53, 0.0  ;;  %v852_v63 = vmax.f32 %v627_v55, 0.0 }
 0x1a6   : > { %1145 = vmatmul.mubr.f32.gmra.mxu0 %v848_v54  ;;  %1306 = vmatmul.mubr.f32.gmra.mxu1 %v850_v48  ;;  %v2081_v41 = vrot.slane %v984_v39, %v456_v37 }
 0x1a7   : > { %v853_v61 = vmax.f32 %v629_v58, 0.0  ;;  %v855_v62 = vmax.f32 %v790_v59, 0.0 }
 0x1a9   : > { %1150 = vmatprep.mubr.f32.mxu0 %v853_v61  ;;  %1311 = vmatprep.mubr.f32.mxu1 %v855_v62 }
 0x1aa   : > { %1151 = vmatmul.mubr.f32.gmra.mxu0 %v852_v63  ;;  %1312 = vmatmul.mubr.f32.gmra.mxu1 %v854_v60 }
 0x22e   : > { %v1062_v42 = vpop.f32.mrf.mxu0  ;;  %v1223_v0 = vpop.f32.mrf.mxu1 }
 0x22f   : > { %v1063_v1 = vadd.f32 %v1062_v42, %v2077_v40 }
 0x230   : > { %v1064_v2 = vpop.f32.mrf.mxu0  ;;  %v1225_v3 = vpop.f32.mrf.mxu1 }
 0x231   : > { %v1224_v4 = vadd.f32 %v1223_v0, %v1063_v1  ;;  %v1065_v5 = vadd.f32 %v1064_v2, %v2081_v41 }
 0x232   : > { %v1068_v6 = vpop.f32.mrf.mxu0  ;;  %v1229_v7 = vpop.f32.mrf.mxu1 }
 0x233   : > { %1318 = vst [vmem:[%s2087_s27] sm:$0xff] %v1224_v4  ;;  %v1226_v33 = vadd.f32 %v1225_v3, %v1065_v5  ;;  %v1069_v35 = vadd.f32 %v1068_v6, %v2077_v40 }
 0x234   : > { %v1070_v37 = vpop.f32.mrf.mxu0  ;;  %v1231_v8 = vpop.f32.mrf.mxu1 }
 0x235   : > { %1319 = vst [vmem:[%s2087_s27 + $0x8] sm:$0xff] %v1226_v33  ;;  %v1230_v9 = vadd.f32 %v1229_v7, %v1069_v35  ;;  %v1071_v10 = vadd.f32 %v1070_v37, %v2081_v41 }
 0x236   : > { %v1074_v11 = vpop.f32.mrf.mxu0  ;;  %v1235_v12 = vpop.f32.mrf.mxu1 }
 0x237   : > { %1320 = vst [vmem:[%s2087_s27 + $0x10] sm:$0xff] %v1230_v9  ;;  %v1232_v13 = vadd.f32 %v1231_v8, %v1071_v10  ;;  %v1075_v14 = vadd.f32 %v1074_v11, %v2077_v40 }
 0x238   : > { %v1076_v15 = vpop.f32.mrf.mxu0  ;;  %v1237_v16 = vpop.f32.mrf.mxu1 }
 0x239   : > { %1321 = vst [vmem:[%s2087_s27 + $0x18] sm:$0xff] %v1232_v13  ;;  %v1236_v17 = vadd.f32 %v1235_v12, %v1075_v14  ;;  %v1077_v18 = vadd.f32 %v1076_v15, %v2081_v41 }
 0x23a   : > { %v1080_v19 = vpop.f32.mrf.mxu0  ;;  %v1241_v20 = vpop.f32.mrf.mxu1 }
 0x23b   : > { %1322 = vst [vmem:[%s2087_s27 + $0x20] sm:$0xff] %v1236_v17  ;;  %v1238_v21 = vadd.f32 %v1237_v16, %v1077_v18  ;;  %v1081_v22 = vadd.f32 %v1080_v19, %v2077_v40 }
 0x23c   : > { %v1082_v23 = vpop.f32.mrf.mxu0  ;;  %v1243_v24 = vpop.f32.mrf.mxu1 }
 0x23d   : > { %1323 = vst [vmem:[%s2087_s27 + $0x28] sm:$0xff] %v1238_v21  ;;  %v1242_v25 = vadd.f32 %v1241_v20, %v1081_v22  ;;  %v1083_v26 = vadd.f32 %v1082_v23, %v2081_v41 }
 0x23e   : > { %v1086_v27 = vpop.f32.mrf.mxu0  ;;  %v1247_v28 = vpop.f32.mrf.mxu1 }
 0x23f   : > { %1324 = vst [vmem:[%s2087_s27 + $0x30] sm:$0xff] %v1242_v25  ;;  %v1244_v29 = vadd.f32 %v1243_v24, %v1083_v26  ;;  %v1087_v30 = vadd.f32 %v1086_v27, %v2077_v40 }
 0x240   : > { %v1088_v31 = vpop.f32.mrf.mxu0  ;;  %v1249_v32 = vpop.f32.mrf.mxu1 }
 0x241   : > { %1325 = vst [vmem:[%s2087_s27 + $0x38] sm:$0xff] %v1244_v29  ;;  %v1248_v34 = vadd.f32 %v1247_v28, %v1087_v30  ;;  %v1089_v36 = vadd.f32 %v1088_v31, %v2081_v41 }
 0x242   : > { %v1092_v38 = vpop.f32.mrf.mxu0  ;;  %v1253_v43 = vpop.f32.mrf.mxu1 }
 0x243   : > { %1326 = vst [vmem:[%s2087_s27 + $0x40] sm:$0xff] %v1248_v34  ;;  %v1250_v44 = vadd.f32 %v1249_v32, %v1089_v36  ;;  %v1093_v45 = vadd.f32 %v1092_v38, %v2077_v40 }
 0x244   : > { %v1094_v46 = vpop.f32.mrf.mxu0  ;;  %v1255_v47 = vpop.f32.mrf.mxu1 }
 0x245   : > { %1327 = vst [vmem:[%s2087_s27 + $0x48] sm:$0xff] %v1250_v44  ;;  %v1254_v48 = vadd.f32 %v1253_v43, %v1093_v45  ;;  %v1095_v49 = vadd.f32 %v1094_v46, %v2081_v41 }
 0x246   : > { %v1098_v50 = vpop.f32.mrf.mxu0  ;;  %v1259_v51 = vpop.f32.mrf.mxu1 }
 0x247   : > { %1328 = vst [vmem:[%s2087_s27 + $0x50] sm:$0xff] %v1254_v48  ;;  %v1256_v52 = vadd.f32 %v1255_v47, %v1095_v49  ;;  %v1099_v53 = vadd.f32 %v1098_v50, %v2077_v40 }
 0x248   : > { %v1100_v54 = vpop.f32.mrf.mxu0  ;;  %v1261_v55 = vpop.f32.mrf.mxu1 }
 0x249   : > { %1329 = vst [vmem:[%s2087_s27 + $0x58] sm:$0xff] %v1256_v52  ;;  %v1260_v56 = vadd.f32 %v1259_v51, %v1099_v53  ;;  %v1101_v57 = vadd.f32 %v1100_v54, %v2081_v41 }
 0x24a   : > { %v1104_v58 = vpop.f32.mrf.mxu0  ;;  %v1265_v59 = vpop.f32.mrf.mxu1 }
 0x24b   : > { %1330 = vst [vmem:[%s2087_s27 + $0x60] sm:$0xff] %v1260_v56  ;;  %v1262_v60 = vadd.f32 %v1261_v55, %v1101_v57  ;;  %v1105_v61 = vadd.f32 %v1104_v58, %v2077_v40 }
 0x24c   : > { %v1106_v62 = vpop.f32.mrf.mxu0  ;;  %v1267_v63 = vpop.f32.mrf.mxu1 }
 0x24d   : > { %1331 = vst [vmem:[%s2087_s27 + $0x68] sm:$0xff] %v1262_v60  ;;  %v1266_v39 = vadd.f32 %v1265_v59, %v1105_v61  ;;  %v1107_v42 = vadd.f32 %v1106_v62, %v2081_v41 }
 0x24e   : > { %v1110_v0 = vpop.f32.mrf.mxu0  ;;  %v1271_v1 = vpop.f32.mrf.mxu1 }
 0x24f   : > { %1332 = vst [vmem:[%s2087_s27 + $0x70] sm:$0xff] %v1266_v39  ;;  %v1268_v2 = vadd.f32 %v1267_v63, %v1107_v42  ;;  %v1111_v3 = vadd.f32 %v1110_v0, %v2077_v40 }
 0x250   : > { %v1112_v4 = vpop.f32.mrf.mxu0  ;;  %v1273_v5 = vpop.f32.mrf.mxu1 }
 0x251   : > { %1333 = vst [vmem:[%s2087_s27 + $0x78] sm:$0xff] %v1268_v2  ;;  %v1272_v6 = vadd.f32 %v1271_v1, %v1111_v3  ;;  %v1113_v7 = vadd.f32 %v1112_v4, %v2081_v41 }
 0x252   : > { %v1116_v33 = vpop.f32.mrf.mxu0  ;;  %v1277_v35 = vpop.f32.mrf.mxu1 }
 0x253   : > { %1334 = vst [vmem:[%s2087_s27 + $0x80] sm:$0xff] %v1272_v6  ;;  %v1274_v37 = vadd.f32 %v1273_v5, %v1113_v7  ;;  %v1117_v8 = vadd.f32 %v1116_v33, %v2077_v40 }
 0x254   : > { %v1118_v9 = vpop.f32.mrf.mxu0  ;;  %v1279_v10 = vpop.f32.mrf.mxu1 }
 0x255   : > { %1335 = vst [vmem:[%s2087_s27 + $0x88] sm:$0xff] %v1274_v37  ;;  %v1278_v11 = vadd.f32 %v1277_v35, %v1117_v8  ;;  %v1119_v12 = vadd.f32 %v1118_v9, %v2081_v41 }
 0x256   : > { %v1122_v13 = vpop.f32.mrf.mxu0  ;;  %v1283_v14 = vpop.f32.mrf.mxu1 }
 0x257   : > { %1336 = vst [vmem:[%s2087_s27 + $0x90] sm:$0xff] %v1278_v11  ;;  %v1280_v15 = vadd.f32 %v1279_v10, %v1119_v12  ;;  %v1123_v16 = vadd.f32 %v1122_v13, %v2077_v40 }
 0x258   : > { %v1124_v17 = vpop.f32.mrf.mxu0  ;;  %v1285_v18 = vpop.f32.mrf.mxu1 }
 0x259   : > { %1337 = vst [vmem:[%s2087_s27 + $0x98] sm:$0xff] %v1280_v15  ;;  %v1284_v19 = vadd.f32 %v1283_v14, %v1123_v16  ;;  %v1125_v20 = vadd.f32 %v1124_v17, %v2081_v41 }
 0x25a   : > { %v1128_v21 = vpop.f32.mrf.mxu0  ;;  %v1289_v22 = vpop.f32.mrf.mxu1 }
 0x25b   : > { %1338 = vst [vmem:[%s2087_s27 + $0xa0] sm:$0xff] %v1284_v19  ;;  %v1286_v23 = vadd.f32 %v1285_v18, %v1125_v20  ;;  %v1129_v24 = vadd.f32 %v1128_v21, %v2077_v40 }
 0x25c   : > { %v1130_v25 = vpop.f32.mrf.mxu0  ;;  %v1291_v26 = vpop.f32.mrf.mxu1 }
 0x25d   : > { %1339 = vst [vmem:[%s2087_s27 + $0xa8] sm:$0xff] %v1286_v23  ;;  %v1290_v27 = vadd.f32 %v1289_v22, %v1129_v24  ;;  %v1131_v28 = vadd.f32 %v1130_v25, %v2081_v41 }
 0x25e   : > { %v1134_v29 = vpop.f32.mrf.mxu0  ;;  %v1295_v30 = vpop.f32.mrf.mxu1 }
 0x25f   : > { %1340 = vst [vmem:[%s2087_s27 + $0xb0] sm:$0xff] %v1290_v27  ;;  %v1292_v31 = vadd.f32 %v1291_v26, %v1131_v28  ;;  %v1135_v32 = vadd.f32 %v1134_v29, %v2077_v40 }
 0x260   : > { %v1136_v34 = vpop.f32.mrf.mxu0  ;;  %v1297_v36 = vpop.f32.mrf.mxu1 }
 0x261   : > { %1341 = vst [vmem:[%s2087_s27 + $0xb8] sm:$0xff] %v1292_v31  ;;  %v1296_v38 = vadd.f32 %v1295_v30, %v1135_v32  ;;  %v1137_v43 = vadd.f32 %v1136_v34, %v2081_v41 }
 0x262   : > { %v1140_v44 = vpop.f32.mrf.mxu0  ;;  %v1301_v45 = vpop.f32.mrf.mxu1 }
 0x263   : > { %1342 = vst [vmem:[%s2087_s27 + $0xc0] sm:$0xff] %v1296_v38  ;;  %v1298_v46 = vadd.f32 %v1297_v36, %v1137_v43  ;;  %v1141_v47 = vadd.f32 %v1140_v44, %v2077_v40 }
 0x264   : > { %v1142_v48 = vpop.f32.mrf.mxu0  ;;  %v1303_v49 = vpop.f32.mrf.mxu1 }
 0x265   : > { %1343 = vst [vmem:[%s2087_s27 + $0xc8] sm:$0xff] %v1298_v46  ;;  %v1302_v50 = vadd.f32 %v1301_v45, %v1141_v47  ;;  %v1143_v51 = vadd.f32 %v1142_v48, %v2081_v41 }
 0x266   : > { %v1146_v52 = vpop.f32.mrf.mxu0  ;;  %v1307_v53 = vpop.f32.mrf.mxu1 }
 0x267   : > { %1344 = vst [vmem:[%s2087_s27 + $0xd0] sm:$0xff] %v1302_v50  ;;  %v1304_v54 = vadd.f32 %v1303_v49, %v1143_v51  ;;  %v1147_v55 = vadd.f32 %v1146_v52, %v2077_v40 }
 0x268   : > { %v1148_v56 = vpop.f32.mrf.mxu0  ;;  %v1309_v57 = vpop.f32.mrf.mxu1 }
 0x269   : > { %1345 = vst [vmem:[%s2087_s27 + $0xd8] sm:$0xff] %v1304_v54  ;;  %v1308_v58 = vadd.f32 %v1307_v53, %v1147_v55  ;;  %v1149_v59 = vadd.f32 %v1148_v56, %v2081_v41 }
 0x26a   : > { %v1152_v60 = vpop.f32.mrf.mxu0  ;;  %v1313_v61 = vpop.f32.mrf.mxu1 }
 0x26b   : > { %1346 = vst [vmem:[%s2087_s27 + $0xe0] sm:$0xff] %v1308_v58  ;;  %v1310_v62 = vadd.f32 %v1309_v57, %v1149_v59  ;;  %v1153_v63 = vadd.f32 %v1152_v60, %v2077_v40 }
 0x26c   : > { %v1154_v39 = vpop.f32.mrf.mxu0  ;;  %v1315_v1 = vpop.f32.mrf.mxu1 }
 0x26d   : > { %1347 = vst [vmem:[%s2087_s27 + $0xe8] sm:$0xff] %v1310_v62  ;;  %v1314_v42 = vadd.f32 %v1313_v61, %v1153_v63  ;;  %v1155_v0 = vadd.f32 %v1154_v39, %v2081_v41 }
 0x26f   : > { %1348 = vst [vmem:[%s2087_s27 + $0xf0] sm:$0xff] %v1314_v42  ;;  %v1316_v40 = vadd.f32 %v1315_v1, %v1155_v0 }
 0x271   : > { %1349 = vst [vmem:[%s2087_s27 + $0xf8] sm:$0xff] %v1316_v40 }
 0x272   : > { %1695 = shalt.err (!%p1692_p9)
}
 0x273   : > { %s1696_s23 = scalar_lea.hbm %s2154_s14, 4096  ;;  %s1700_s24 = scalar_lea.hbm %s2206_s5, 8192 }
 0x274   : > { %p1697_p1 = scmp.ne.s32.totalorder %s2154_s14, %s1696_s23  ;;  %p1701_p11 = scmp.lt.s32.totalorder %s2154_s14, %s2206_s5 }
 0x275   : > { %p1702_p13 = scmp.lt.s32.totalorder %s1700_s24, %s1696_s23 }
 0x276   : > { %p1698_p8 = pnand %p1697_p1, %p2226_p6 }
 0x277   : > { %p1703_p2 = por %p1702_p13, %p1701_p11 }
 0x278   : > { %p1699_p10 = pneg %p1698_p8 }
 0x27a   : > { %p1704_p4 = pnand %p1703_p2, %p1699_p10 }
 0x27c   : > { %1707 = shalt.err (!%p1704_p4)
}
 0x27d   : > { %s1765_s15 = smov 256   ;;  %s1766_s30 = smov 16  }
 0x27e   : > { %1507 = dma.vmem_to_hbm [thread:$0]  (%p2226_p6), %s2156_s17, 4096, %s2154_s14, %s1351_s22, %s1765_s15, %s1765_s15, %s1766_s30  }
 0x27f PF: > { %s1380_s13 = sand.u32 1, %s1742_s18   ;;  %p2227_p12 = scmp.ne.s32.totalorder %s2213_s25, 0 }
 0x280   : > { %p2228_p0 = scmp.ge.s32.totalorder %s1754_s21, 2  ;;  %s1381_s11 = scalar_lea.sflag [#allocation4], %s1380_s13 }
 0x282   : > { %p1524_p5 = pnand %p2228_p0, %p2227_p12 }
 0x284   : > { %p1525_p3 = pneg %p1524_p5 }
 0x286   : > { %1737 = dma.done.wait (%p1525_p3), %s1381_s11, 4096  }
 0x287   : > { %1739 = vsyncadd (%p1525_p3), %s1381_s11, 4294963200  ;;  %p20_p7 = scmp.ge.s32.totalorder %s1880_s6, 4   ;;  %s2229_s18 = smov %s1746_s19 }
 0x288   : > { %s2230_s19 = smov %s1750_s20  ;;  %s2231_s20 = smov %s1890_s10 }
 0x289   : > { %s2232_s21 = smov %s1880_s6  ;;  %22 = sbr.rel (!%p20_p7) target bundleno = 7 (0x7), region = 97 }
 0x28e   :  { %1386 = vsyncpa [#allocation3], 1 }
 0x28f   :  { %1388 = vsyncpa [#allocation3 + $0x1], 1 }
 0x290   :  { %1389 = vsyncpa [#allocation6], 1 }
 0x291   :  { %1390 = vsyncpa [#allocation9], 1 }
 0x292   :  { %1391 = vsyncpa [#allocation4], 1 }
 0x293   :  { %1393 = vsyncpa [#allocation4 + $0x1], 1 }

</bundles_post_ra>
